<compile_context>
chip_gen: v6e
topology: v6e:2x2x1
jax: 0.10.0
libtpu: 0.0.40
codegen_flags: <defaults>
</compile_context>

<pallas_src>
import functools
import math

import jax
import jax.numpy as jnp
from jax import lax
from jax.experimental import pallas as pl
from jax.experimental.pallas import tpu as pltpu

LN_EPS = 1e-5                       # nn.LayerNorm default
_INV_SQRT2 = 1.0 / math.sqrt(2.0)


def _round_up(n, m):
    return ((n + m - 1) // m) * m


def _gelu_exact(x):
    # PyTorch nn.GELU(approximate='none'): 0.5 * x * (1 + erf(x / sqrt(2)))
    return 0.5 * x * (1.0 + lax.erf(x * _INV_SQRT2))


def resmlp_kernel(x_ref, w_in_ref, b_in_ref,
                  w_h_ref, b_h_ref, g_ref, beta_ref,
                  w_out_ref, b_out_ref, o_ref, h_acc_ref,
                  *, depth, inv_hidden):
    """Fused ResMLP forward for one batch tile. All params resident in VMEM.

    x_ref is bf16 [tile, in_p]; weights are bf16; biases / LN params are f32
    rows of shape (1, hid_p). The f32 residual accumulator lives in the VMEM
    scratch h_acc_ref.
    """
    # inLayer: bf16 MXU matmul, f32 accumulate, fused bias add.
    h_acc_ref[...] = (
        jnp.dot(x_ref[...], w_in_ref[...], preferred_element_type=jnp.float32)
        + b_in_ref[...])

    # Residual blocks: h = h + GELU(LN(h) @ W_d + b_d)     (depth is static)
    for d in range(depth):
        h = h_acc_ref[...]                                  # f32 [tile, hid_p]
        # One-pass LayerNorm statistics over the TRUE hidden width
        # (padded lanes of h are exactly zero, so plain sums are correct).
        s = jnp.sum(h, axis=-1, keepdims=True)
        s2 = jnp.sum(h * h, axis=-1, keepdims=True)
        mu = s * inv_hidden
        var = s2 * inv_hidden - mu * mu
        hn = (h - mu) * lax.rsqrt(var + LN_EPS)
        hn = hn * g_ref[d] + beta_ref[d]                    # (1, hid_p) lane-wise
        y = (jnp.dot(hn.astype(jnp.bfloat16), w_h_ref[d],
                     preferred_element_type=jnp.float32)
             + b_h_ref[d])
        h_acc_ref[...] = h + _gelu_exact(y)

    # outLayer
    out = (jnp.dot(h_acc_ref[...].astype(jnp.bfloat16), w_out_ref[...],
                   preferred_element_type=jnp.float32)
           + b_out_ref[...])
    o_ref[...] = out.astype(o_ref.dtype)


def resmlp_forward(x, params, *, tile_b=256):
    """x: [B, in_dim] float32. Returns [B, out_dim] float32."""
    w_in, b_in, w_h, b_h, g, beta, w_out, b_out = params
    B, in_dim = x.shape
    hidden = w_in.shape[1]
    out_dim = w_out.shape[1]
    depth = w_h.shape[0]

    # Lane-align feature dims (multiples of 128), sublane-align the batch tile.
    in_p = _round_up(in_dim, 128)
    hid_p = _round_up(hidden, 128)
    out_p = _round_up(out_dim, 128)
    tile = _round_up(max(8, min(tile_b, _round_up(B, 8))), 8)
    B_p = _round_up(B, tile)
    grid = (B_p // tile,)

    f32, bf16 = jnp.float32, jnp.bfloat16

    def pad2(a, r, c):
        return jnp.pad(a, ((0, r - a.shape[0]), (0, c - a.shape[1])))

    # Zero padding keeps padded hidden lanes exactly zero through the whole
    # residual chain (padded gamma/beta/bias are 0), so the math is unchanged.
    x_p = pad2(x, B_p, in_p).astype(bf16)
    w_in_p = pad2(w_in, in_p, hid_p).astype(bf16)
    w_out_p = pad2(w_out, hid_p, out_p).astype(bf16)
    w_h_p = jnp.pad(w_h, ((0, 0), (0, hid_p - hidden),
                          (0, hid_p - hidden))).astype(bf16)
    b_in_p = pad2(b_in.reshape(1, -1), 1, hid_p).astype(f32)
    b_out_p = pad2(b_out.reshape(1, -1), 1, out_p).astype(f32)

    def pad_rows(a):  # (depth, hidden) -> (depth, 1, hid_p) f32
        return jnp.pad(a, ((0, 0), (0, hid_p - hidden))
                       ).reshape(depth, 1, hid_p).astype(f32)

    b_h_p, g_p, beta_p = pad_rows(b_h), pad_rows(g), pad_rows(beta)

    args = (x_p, w_in_p, b_in_p, w_h_p, b_h_p, g_p, beta_p, w_out_p, b_out_p)
    param_args = args[1:]

    # VMEM budget: params single-buffered, x/out tiles double-buffered,
    # plus the f32 residual accumulator scratch.
    bytes_params = sum(int(a.size) * a.dtype.itemsize for a in param_args)
    bytes_needed = (bytes_params
                    + 2 * tile * in_p * 2      # x tile (bf16), double-buffered
                    + 2 * tile * out_p * 4     # out tile (f32), double-buffered
                    + tile * hid_p * 4)        # residual accumulator scratch
    # TODO(synk): if bytes_params exceeds ~40 MiB (v7x has only 64 MiB VMEM),
    # stream w_h per depth block over an extra grid axis instead of keeping the
    # whole stack resident.
    vmem_limit = int(min(max(2 * bytes_needed, 32 << 20), 96 << 20))

    kernel = functools.partial(resmlp_kernel, depth=depth,
                               inv_hidden=1.0 / hidden)

    def build(single_buffer_params):
        def param_spec(a):
            nd = a.ndim
            if single_buffer_params:
                # Grid-invariant: one VMEM buffer is enough, halves param VMEM.
                return pl.BlockSpec(a.shape, lambda *_: (0,) * nd,
                                    pipeline_mode=pl.Buffered(1))
            return pl.BlockSpec(a.shape, lambda *_: (0,) * nd)

        in_specs = [pl.BlockSpec((tile, in_p), lambda i: (i, 0))]
        in_specs += [param_spec(a) for a in param_args]

        return pl.pallas_call(
            kernel,
            out_shape=jax.ShapeDtypeStruct((B_p, out_p), jnp.float32),
            grid_spec=pltpu.PrefetchScalarGridSpec(
                num_scalar_prefetch=0,
                grid=grid,
                in_specs=in_specs,
                out_specs=pl.BlockSpec((tile, out_p), lambda i: (i, 0)),
                scratch_shapes=[pltpu.VMEM((tile, hid_p), jnp.float32)],
            ),
            compiler_params=pltpu.CompilerParams(
                dimension_semantics=("parallel",),
                vmem_limit_bytes=vmem_limit),
        )(*args)

    try:
        out_full = build(single_buffer_params=True)
    except Exception:
        # Fallback if this jax version rejects pipeline_mode=pl.Buffered(1):
        # default double-buffered params (correct, just more VMEM).
        out_full = build(single_buffer_params=False)

    return out_full[:B, :out_dim]


def init_params(key, in_dim, out_dim, hidden, depth):
    """Deterministic synthetic parameters (Linear stored as [in, out])."""
    ks = jax.random.split(key, 8)
    scale_in = 1.0 / math.sqrt(in_dim)
    scale_h = 1.0 / math.sqrt(hidden)
    w_in = jax.random.uniform(ks[0], (in_dim, hidden), jnp.float32, -scale_in, scale_in)
    b_in = jax.random.uniform(ks[1], (hidden,), jnp.float32, -scale_in, scale_in)
    w_h = jax.random.uniform(ks[2], (depth, hidden, hidden), jnp.float32, -scale_h, scale_h)
    b_h = jax.random.uniform(ks[3], (depth, hidden), jnp.float32, -scale_h, scale_h)
    g = jnp.ones((depth, hidden), jnp.float32)       # LayerNorm weight init
    beta = jnp.zeros((depth, hidden), jnp.float32)   # LayerNorm bias init
    w_out = jax.random.uniform(ks[4], (hidden, out_dim), jnp.float32, -scale_h, scale_h)
    b_out = jax.random.uniform(ks[5], (out_dim,), jnp.float32, -scale_h, scale_h)
    return (w_in, b_in, w_h, b_h, g, beta, w_out, b_out)


def resmlp_reference(x, params, *, mimic_bf16=True):
    """Pure-JAX reference of the same forward (bf16 matmuls, f32 accumulate)."""
    w_in, b_in, w_h, b_h, g, beta, w_out, b_out = params

    def mm(a, w):
        if mimic_bf16:
            return jnp.dot(a.astype(jnp.bfloat16), w.astype(jnp.bfloat16),
                           preferred_element_type=jnp.float32)
        return a @ w

    def ln(h, gamma, beta_):
        mu = jnp.mean(h, axis=-1, keepdims=True)
        var = jnp.mean((h - mu) ** 2, axis=-1, keepdims=True)
        return (h - mu) * lax.rsqrt(var + LN_EPS) * gamma + beta_

    h = mm(x, w_in) + b_in
    for d in range(w_h.shape[0]):
        h = h + _gelu_exact(mm(ln(h, g[d], beta[d]), w_h[d]) + b_h[d])
    return mm(h, w_out) + b_out


if __name__ == "__main__":
    key = jax.random.PRNGKey(0)
    in_dim, out_dim, hidden, depth = 16, 8, 32, 3
    batch = 16

    kx, kp = jax.random.split(key)
    x = jax.random.normal(kx, (batch, in_dim), jnp.float32)
    params = init_params(kp, in_dim, out_dim, hidden, depth)

    out = jax.block_until_ready(resmlp_forward(x, params))
    ref = resmlp_reference(x, params, mimic_bf16=True)

    assert out.shape == (batch, out_dim)
    max_err = float(jnp.max(jnp.abs(out - ref)))
    assert jnp.allclose(out, ref, atol=5e-3, rtol=5e-3), f"mismatch: {max_err}"

    print("KERNEL_OK")
</pallas_src>

<mosaic_0001>
module attributes {stable_mosaic.version = 11 : i64} {
  func.func @resmlp_kernel(%arg0: i32, %arg1: memref<16x128xbf16, #tpu.memory_space<vmem>>, %arg2: memref<128x128xbf16, #tpu.memory_space<vmem>>, %arg3: memref<1x128xf32, #tpu.memory_space<vmem>>, %arg4: memref<3x128x128xbf16, #tpu.memory_space<vmem>>, %arg5: memref<3x1x128xf32, #tpu.memory_space<vmem>>, %arg6: memref<3x1x128xf32, #tpu.memory_space<vmem>>, %arg7: memref<3x1x128xf32, #tpu.memory_space<vmem>>, %arg8: memref<128x128xbf16, #tpu.memory_space<vmem>>, %arg9: memref<1x128xf32, #tpu.memory_space<vmem>>, %arg10: memref<16x128xf32, #tpu.memory_space<vmem>>, %arg11: memref<16x128xf32, #tpu.memory_space<vmem>>) attributes {dimension_semantics = [#tpu.dimension_semantics<parallel>], iteration_bounds = array<i64: 1>, scalar_prefetch = 0 : i64, scratch_operands = 1 : i64, tpu.core_type = #tpu.core_type<tc>, window_params = [{transform_indices = @transform_0, window_bounds = array<i64: 16, 128>}, {pipeline_mode = #tpu.pipeline_mode<synchronous>, transform_indices = @transform_1, window_bounds = array<i64: 128, 128>}, {pipeline_mode = #tpu.pipeline_mode<synchronous>, transform_indices = @transform_2, window_bounds = array<i64: 1, 128>}, {pipeline_mode = #tpu.pipeline_mode<synchronous>, transform_indices = @transform_3, window_bounds = array<i64: 3, 128, 128>}, {pipeline_mode = #tpu.pipeline_mode<synchronous>, transform_indices = @transform_4, window_bounds = array<i64: 3, 1, 128>}, {pipeline_mode = #tpu.pipeline_mode<synchronous>, transform_indices = @transform_5, window_bounds = array<i64: 3, 1, 128>}, {pipeline_mode = #tpu.pipeline_mode<synchronous>, transform_indices = @transform_6, window_bounds = array<i64: 3, 1, 128>}, {pipeline_mode = #tpu.pipeline_mode<synchronous>, transform_indices = @transform_7, window_bounds = array<i64: 128, 128>}, {pipeline_mode = #tpu.pipeline_mode<synchronous>, transform_indices = @transform_8, window_bounds = array<i64: 1, 128>}, {transform_indices = @transform_9, window_bounds = array<i64: 16, 128>}]} {
    %c0 = arith.constant 0 : index
    %c0_0 = arith.constant 0 : index
    %0 = vector.load %arg1[%c0, %c0_0] : memref<16x128xbf16, #tpu.memory_space<vmem>>, vector<16x128xbf16>
    %c0_1 = arith.constant 0 : index
    %c0_2 = arith.constant 0 : index
    %1 = vector.load %arg2[%c0_1, %c0_2] : memref<128x128xbf16, #tpu.memory_space<vmem>>, vector<128x128xbf16>
    %cst = arith.constant dense<0.000000e+00> : vector<16x128xf32>
    %2 = tpu.matmul %0, %1, %cst {dimension_numbers = #tpu.dot_dimension_numbers<[1], [0], [0], [1], [0, 0, 1, 1], [], []>} : vector<16x128xbf16>, vector<128x128xbf16>, vector<16x128xf32> -> vector<16x128xf32>
    %c0_3 = arith.constant 0 : index
    %c0_4 = arith.constant 0 : index
    %3 = vector.load %arg3[%c0_3, %c0_4] : memref<1x128xf32, #tpu.memory_space<vmem>>, vector<1x128xf32>
    %4 = vector.broadcast %3 : vector<1x128xf32> to vector<16x128xf32>
    %5 = arith.addf %2, %4 : vector<16x128xf32>
    %c0_5 = arith.constant 0 : index
    %c0_6 = arith.constant 0 : index
    %6 = vector.load %arg11[%c0_5, %c0_6] : memref<16x128xf32, #tpu.memory_space<vmem>>, vector<16x128xf32>
    tpu.vector_store %arg11[%c0_5, %c0_6], %5 {strides = array<i32>} : memref<16x128xf32, #tpu.memory_space<vmem>>, vector<16x128xf32>,
    %c0_7 = arith.constant 0 : index
    %c0_8 = arith.constant 0 : index
    %7 = vector.load %arg11[%c0_7, %c0_8] : memref<16x128xf32, #tpu.memory_space<vmem>>, vector<16x128xf32>
    %cst_9 = arith.constant dense<0.000000e+00> : vector<16xf32>
    %8 = vector.multi_reduction <add>, %7, %cst_9 [1] : vector<16x128xf32> to vector<16xf32>
    %9 = vector.shape_cast %8 : vector<16xf32> to vector<16x1xf32>
    %10 = arith.mulf %7, %7 : vector<16x128xf32>
    %cst_10 = arith.constant dense<0.000000e+00> : vector<16xf32>
    %11 = vector.multi_reduction <add>, %10, %cst_10 [1] : vector<16x128xf32> to vector<16xf32>
    %12 = vector.shape_cast %11 : vector<16xf32> to vector<16x1xf32>
    %cst_11 = arith.constant 3.125000e-02 : f32
    %13 = vector.broadcast %cst_11 : f32 to vector<16x1xf32>
    %14 = arith.mulf %9, %13 : vector<16x1xf32>
    %cst_12 = arith.constant 3.125000e-02 : f32
    %15 = vector.broadcast %cst_12 : f32 to vector<16x1xf32>
    %16 = arith.mulf %12, %15 : vector<16x1xf32>
    %17 = arith.mulf %14, %14 : vector<16x1xf32>
    %18 = arith.subf %16, %17 : vector<16x1xf32>
    %19 = vector.broadcast %14 : vector<16x1xf32> to vector<16x128xf32>
    %20 = arith.subf %7, %19 : vector<16x128xf32>
    %cst_13 = arith.constant 9.99999974E-6 : f32
    %21 = vector.broadcast %cst_13 : f32 to vector<16x1xf32>
    %22 = arith.addf %18, %21 : vector<16x1xf32>
    %23 = math.rsqrt %22 : vector<16x1xf32>
    %24 = vector.broadcast %23 : vector<16x1xf32> to vector<16x128xf32>
    %25 = arith.mulf %20, %24 : vector<16x128xf32>
    %c0_14 = arith.constant 0 : index
    %c0_15 = arith.constant 0 : index
    %c0_16 = arith.constant 0 : index
    %26 = vector.load %arg6[%c0_14, %c0_15, %c0_16] : memref<3x1x128xf32, #tpu.memory_space<vmem>>, vector<1x1x128xf32>
    %27 = vector.shape_cast %26 : vector<1x1x128xf32> to vector<1x128xf32>
    %28 = vector.broadcast %27 : vector<1x128xf32> to vector<16x128xf32>
    %29 = arith.mulf %25, %28 : vector<16x128xf32>
    %c0_17 = arith.constant 0 : index
    %c0_18 = arith.constant 0 : index
    %c0_19 = arith.constant 0 : index
    %30 = vector.load %arg7[%c0_17, %c0_18, %c0_19] : memref<3x1x128xf32, #tpu.memory_space<vmem>>, vector<1x1x128xf32>
    %31 = vector.shape_cast %30 : vector<1x1x128xf32> to vector<1x128xf32>
    %32 = vector.broadcast %31 : vector<1x128xf32> to vector<16x128xf32>
    %33 = arith.addf %29, %32 : vector<16x128xf32>
    %34 = arith.truncf %33 : vector<16x128xf32> to vector<16x128xbf16>
    %c0_20 = arith.constant 0 : index
    %c0_21 = arith.constant 0 : index
    %c0_22 = arith.constant 0 : index
    %35 = vector.load %arg4[%c0_20, %c0_21, %c0_22] : memref<3x128x128xbf16, #tpu.memory_space<vmem>>, vector<1x128x128xbf16>
    %36 = vector.shape_cast %35 : vector<1x128x128xbf16> to vector<128x128xbf16>
    %cst_23 = arith.constant dense<0.000000e+00> : vector<16x128xf32>
    %37 = tpu.matmul %34, %36, %cst_23 {dimension_numbers = #tpu.dot_dimension_numbers<[1], [0], [0], [1], [0, 0, 1, 1], [], []>} : vector<16x128xbf16>, vector<128x128xbf16>, vector<16x128xf32> -> vector<16x128xf32>
    %c0_24 = arith.constant 0 : index
    %c0_25 = arith.constant 0 : index
    %c0_26 = arith.constant 0 : index
    %38 = vector.load %arg5[%c0_24, %c0_25, %c0_26] : memref<3x1x128xf32, #tpu.memory_space<vmem>>, vector<1x1x128xf32>
    %39 = vector.shape_cast %38 : vector<1x1x128xf32> to vector<1x128xf32>
    %40 = vector.broadcast %39 : vector<1x128xf32> to vector<16x128xf32>
    %41 = arith.addf %37, %40 : vector<16x128xf32>
    %cst_27 = arith.constant 5.000000e-01 : f32
    %42 = vector.broadcast %cst_27 : f32 to vector<16x128xf32>
    %43 = arith.mulf %42, %41 : vector<16x128xf32>
    %cst_28 = arith.constant 0.707106769 : f32
    %44 = vector.broadcast %cst_28 : f32 to vector<16x128xf32>
    %45 = arith.mulf %41, %44 : vector<16x128xf32>
    %46 = math.erf %45 : vector<16x128xf32>
    %cst_29 = arith.constant 1.000000e+00 : f32
    %47 = vector.broadcast %cst_29 : f32 to vector<16x128xf32>
    %48 = arith.addf %47, %46 : vector<16x128xf32>
    %49 = arith.mulf %43, %48 : vector<16x128xf32>
    %50 = arith.addf %7, %49 : vector<16x128xf32>
    %c0_30 = arith.constant 0 : index
    %c0_31 = arith.constant 0 : index
    %51 = vector.load %arg11[%c0_30, %c0_31] : memref<16x128xf32, #tpu.memory_space<vmem>>, vector<16x128xf32>
    tpu.vector_store %arg11[%c0_30, %c0_31], %50 {strides = array<i32>} : memref<16x128xf32, #tpu.memory_space<vmem>>, vector<16x128xf32>,
    %c0_32 = arith.constant 0 : index
    %c0_33 = arith.constant 0 : index
    %52 = vector.load %arg11[%c0_32, %c0_33] : memref<16x128xf32, #tpu.memory_space<vmem>>, vector<16x128xf32>
    %cst_34 = arith.constant dense<0.000000e+00> : vector<16xf32>
    %53 = vector.multi_reduction <add>, %52, %cst_34 [1] : vector<16x128xf32> to vector<16xf32>
    %54 = vector.shape_cast %53 : vector<16xf32> to vector<16x1xf32>
    %55 = arith.mulf %52, %52 : vector<16x128xf32>
    %cst_35 = arith.constant dense<0.000000e+00> : vector<16xf32>
    %56 = vector.multi_reduction <add>, %55, %cst_35 [1] : vector<16x128xf32> to vector<16xf32>
    %57 = vector.shape_cast %56 : vector<16xf32> to vector<16x1xf32>
    %cst_36 = arith.constant 3.125000e-02 : f32
    %58 = vector.broadcast %cst_36 : f32 to vector<16x1xf32>
    %59 = arith.mulf %54, %58 : vector<16x1xf32>
    %cst_37 = arith.constant 3.125000e-02 : f32
    %60 = vector.broadcast %cst_37 : f32 to vector<16x1xf32>
    %61 = arith.mulf %57, %60 : vector<16x1xf32>
    %62 = arith.mulf %59, %59 : vector<16x1xf32>
    %63 = arith.subf %61, %62 : vector<16x1xf32>
    %64 = vector.broadcast %59 : vector<16x1xf32> to vector<16x128xf32>
    %65 = arith.subf %52, %64 : vector<16x128xf32>
    %cst_38 = arith.constant 9.99999974E-6 : f32
    %66 = vector.broadcast %cst_38 : f32 to vector<16x1xf32>
    %67 = arith.addf %63, %66 : vector<16x1xf32>
    %68 = math.rsqrt %67 : vector<16x1xf32>
    %69 = vector.broadcast %68 : vector<16x1xf32> to vector<16x128xf32>
    %70 = arith.mulf %65, %69 : vector<16x128xf32>
    %c1 = arith.constant 1 : index
    %c0_39 = arith.constant 0 : index
    %c0_40 = arith.constant 0 : index
    %71 = vector.load %arg6[%c1, %c0_39, %c0_40] : memref<3x1x128xf32, #tpu.memory_space<vmem>>, vector<1x1x128xf32>
    %72 = vector.shape_cast %71 : vector<1x1x128xf32> to vector<1x128xf32>
    %73 = vector.broadcast %72 : vector<1x128xf32> to vector<16x128xf32>
    %74 = arith.mulf %70, %73 : vector<16x128xf32>
    %c1_41 = arith.constant 1 : index
    %c0_42 = arith.constant 0 : index
    %c0_43 = arith.constant 0 : index
    %75 = vector.load %arg7[%c1_41, %c0_42, %c0_43] : memref<3x1x128xf32, #tpu.memory_space<vmem>>, vector<1x1x128xf32>
    %76 = vector.shape_cast %75 : vector<1x1x128xf32> to vector<1x128xf32>
    %77 = vector.broadcast %76 : vector<1x128xf32> to vector<16x128xf32>
    %78 = arith.addf %74, %77 : vector<16x128xf32>
    %79 = arith.truncf %78 : vector<16x128xf32> to vector<16x128xbf16>
    %c1_44 = arith.constant 1 : index
    %c0_45 = arith.constant 0 : index
    %c0_46 = arith.constant 0 : index
    %80 = vector.load %arg4[%c1_44, %c0_45, %c0_46] : memref<3x128x128xbf16, #tpu.memory_space<vmem>>, vector<1x128x128xbf16>
    %81 = vector.shape_cast %80 : vector<1x128x128xbf16> to vector<128x128xbf16>
    %cst_47 = arith.constant dense<0.000000e+00> : vector<16x128xf32>
    %82 = tpu.matmul %79, %81, %cst_47 {dimension_numbers = #tpu.dot_dimension_numbers<[1], [0], [0], [1], [0, 0, 1, 1], [], []>} : vector<16x128xbf16>, vector<128x128xbf16>, vector<16x128xf32> -> vector<16x128xf32>
    %c1_48 = arith.constant 1 : index
    %c0_49 = arith.constant 0 : index
    %c0_50 = arith.constant 0 : index
    %83 = vector.load %arg5[%c1_48, %c0_49, %c0_50] : memref<3x1x128xf32, #tpu.memory_space<vmem>>, vector<1x1x128xf32>
    %84 = vector.shape_cast %83 : vector<1x1x128xf32> to vector<1x128xf32>
    %85 = vector.broadcast %84 : vector<1x128xf32> to vector<16x128xf32>
    %86 = arith.addf %82, %85 : vector<16x128xf32>
    %cst_51 = arith.constant 5.000000e-01 : f32
    %87 = vector.broadcast %cst_51 : f32 to vector<16x128xf32>
    %88 = arith.mulf %87, %86 : vector<16x128xf32>
    %cst_52 = arith.constant 0.707106769 : f32
    %89 = vector.broadcast %cst_52 : f32 to vector<16x128xf32>
    %90 = arith.mulf %86, %89 : vector<16x128xf32>
    %91 = math.erf %90 : vector<16x128xf32>
    %cst_53 = arith.constant 1.000000e+00 : f32
    %92 = vector.broadcast %cst_53 : f32 to vector<16x128xf32>
    %93 = arith.addf %92, %91 : vector<16x128xf32>
    %94 = arith.mulf %88, %93 : vector<16x128xf32>
    %95 = arith.addf %52, %94 : vector<16x128xf32>
    %c0_54 = arith.constant 0 : index
    %c0_55 = arith.constant 0 : index
    %96 = vector.load %arg11[%c0_54, %c0_55] : memref<16x128xf32, #tpu.memory_space<vmem>>, vector<16x128xf32>
    tpu.vector_store %arg11[%c0_54, %c0_55], %95 {strides = array<i32>} : memref<16x128xf32, #tpu.memory_space<vmem>>, vector<16x128xf32>,
    %c0_56 = arith.constant 0 : index
    %c0_57 = arith.constant 0 : index
    %97 = vector.load %arg11[%c0_56, %c0_57] : memref<16x128xf32, #tpu.memory_space<vmem>>, vector<16x128xf32>
    %cst_58 = arith.constant dense<0.000000e+00> : vector<16xf32>
    %98 = vector.multi_reduction <add>, %97, %cst_58 [1] : vector<16x128xf32> to vector<16xf32>
    %99 = vector.shape_cast %98 : vector<16xf32> to vector<16x1xf32>
    %100 = arith.mulf %97, %97 : vector<16x128xf32>
    %cst_59 = arith.constant dense<0.000000e+00> : vector<16xf32>
    %101 = vector.multi_reduction <add>, %100, %cst_59 [1] : vector<16x128xf32> to vector<16xf32>
    %102 = vector.shape_cast %101 : vector<16xf32> to vector<16x1xf32>
    %cst_60 = arith.constant 3.125000e-02 : f32
    %103 = vector.broadcast %cst_60 : f32 to vector<16x1xf32>
    %104 = arith.mulf %99, %103 : vector<16x1xf32>
    %cst_61 = arith.constant 3.125000e-02 : f32
    %105 = vector.broadcast %cst_61 : f32 to vector<16x1xf32>
    %106 = arith.mulf %102, %105 : vector<16x1xf32>
    %107 = arith.mulf %104, %104 : vector<16x1xf32>
    %108 = arith.subf %106, %107 : vector<16x1xf32>
    %109 = vector.broadcast %104 : vector<16x1xf32> to vector<16x128xf32>
    %110 = arith.subf %97, %109 : vector<16x128xf32>
    %cst_62 = arith.constant 9.99999974E-6 : f32
    %111 = vector.broadcast %cst_62 : f32 to vector<16x1xf32>
    %112 = arith.addf %108, %111 : vector<16x1xf32>
    %113 = math.rsqrt %112 : vector<16x1xf32>
    %114 = vector.broadcast %113 : vector<16x1xf32> to vector<16x128xf32>
    %115 = arith.mulf %110, %114 : vector<16x128xf32>
    %c2 = arith.constant 2 : index
    %c0_63 = arith.constant 0 : index
    %c0_64 = arith.constant 0 : index
    %116 = vector.load %arg6[%c2, %c0_63, %c0_64] : memref<3x1x128xf32, #tpu.memory_space<vmem>>, vector<1x1x128xf32>
    %117 = vector.shape_cast %116 : vector<1x1x128xf32> to vector<1x128xf32>
    %118 = vector.broadcast %117 : vector<1x128xf32> to vector<16x128xf32>
    %119 = arith.mulf %115, %118 : vector<16x128xf32>
    %c2_65 = arith.constant 2 : index
    %c0_66 = arith.constant 0 : index
    %c0_67 = arith.constant 0 : index
    %120 = vector.load %arg7[%c2_65, %c0_66, %c0_67] : memref<3x1x128xf32, #tpu.memory_space<vmem>>, vector<1x1x128xf32>
    %121 = vector.shape_cast %120 : vector<1x1x128xf32> to vector<1x128xf32>
    %122 = vector.broadcast %121 : vector<1x128xf32> to vector<16x128xf32>
    %123 = arith.addf %119, %122 : vector<16x128xf32>
    %124 = arith.truncf %123 : vector<16x128xf32> to vector<16x128xbf16>
    %c2_68 = arith.constant 2 : index
    %c0_69 = arith.constant 0 : index
    %c0_70 = arith.constant 0 : index
    %125 = vector.load %arg4[%c2_68, %c0_69, %c0_70] : memref<3x128x128xbf16, #tpu.memory_space<vmem>>, vector<1x128x128xbf16>
    %126 = vector.shape_cast %125 : vector<1x128x128xbf16> to vector<128x128xbf16>
    %cst_71 = arith.constant dense<0.000000e+00> : vector<16x128xf32>
    %127 = tpu.matmul %124, %126, %cst_71 {dimension_numbers = #tpu.dot_dimension_numbers<[1], [0], [0], [1], [0, 0, 1, 1], [], []>} : vector<16x128xbf16>, vector<128x128xbf16>, vector<16x128xf32> -> vector<16x128xf32>
    %c2_72 = arith.constant 2 : index
    %c0_73 = arith.constant 0 : index
    %c0_74 = arith.constant 0 : index
    %128 = vector.load %arg5[%c2_72, %c0_73, %c0_74] : memref<3x1x128xf32, #tpu.memory_space<vmem>>, vector<1x1x128xf32>
    %129 = vector.shape_cast %128 : vector<1x1x128xf32> to vector<1x128xf32>
    %130 = vector.broadcast %129 : vector<1x128xf32> to vector<16x128xf32>
    %131 = arith.addf %127, %130 : vector<16x128xf32>
    %cst_75 = arith.constant 5.000000e-01 : f32
    %132 = vector.broadcast %cst_75 : f32 to vector<16x128xf32>
    %133 = arith.mulf %132, %131 : vector<16x128xf32>
    %cst_76 = arith.constant 0.707106769 : f32
    %134 = vector.broadcast %cst_76 : f32 to vector<16x128xf32>
    %135 = arith.mulf %131, %134 : vector<16x128xf32>
    %136 = math.erf %135 : vector<16x128xf32>
    %cst_77 = arith.constant 1.000000e+00 : f32
    %137 = vector.broadcast %cst_77 : f32 to vector<16x128xf32>
    %138 = arith.addf %137, %136 : vector<16x128xf32>
    %139 = arith.mulf %133, %138 : vector<16x128xf32>
    %140 = arith.addf %97, %139 : vector<16x128xf32>
    %c0_78 = arith.constant 0 : index
    %c0_79 = arith.constant 0 : index
    %141 = vector.load %arg11[%c0_78, %c0_79] : memref<16x128xf32, #tpu.memory_space<vmem>>, vector<16x128xf32>
    tpu.vector_store %arg11[%c0_78, %c0_79], %140 {strides = array<i32>} : memref<16x128xf32, #tpu.memory_space<vmem>>, vector<16x128xf32>,
    %c0_80 = arith.constant 0 : index
    %c0_81 = arith.constant 0 : index
    %142 = vector.load %arg11[%c0_80, %c0_81] : memref<16x128xf32, #tpu.memory_space<vmem>>, vector<16x128xf32>
    %143 = arith.truncf %142 : vector<16x128xf32> to vector<16x128xbf16>
    %c0_82 = arith.constant 0 : index
    %c0_83 = arith.constant 0 : index
    %144 = vector.load %arg8[%c0_82, %c0_83] : memref<128x128xbf16, #tpu.memory_space<vmem>>, vector<128x128xbf16>
    %cst_84 = arith.constant dense<0.000000e+00> : vector<16x128xf32>
    %145 = tpu.matmul %143, %144, %cst_84 {dimension_numbers = #tpu.dot_dimension_numbers<[1], [0], [0], [1], [0, 0, 1, 1], [], []>} : vector<16x128xbf16>, vector<128x128xbf16>, vector<16x128xf32> -> vector<16x128xf32>
    %c0_85 = arith.constant 0 : index
    %c0_86 = arith.constant 0 : index
    %146 = vector.load %arg9[%c0_85, %c0_86] : memref<1x128xf32, #tpu.memory_space<vmem>>, vector<1x128xf32>
    %147 = vector.broadcast %146 : vector<1x128xf32> to vector<16x128xf32>
    %148 = arith.addf %145, %147 : vector<16x128xf32>
    %c0_87 = arith.constant 0 : index
    %c0_88 = arith.constant 0 : index
    %149 = vector.load %arg10[%c0_87, %c0_88] : memref<16x128xf32, #tpu.memory_space<vmem>>, vector<16x128xf32>
    tpu.vector_store %arg10[%c0_87, %c0_88], %148 {strides = array<i32>} : memref<16x128xf32, #tpu.memory_space<vmem>>, vector<16x128xf32>,
    return
  }
  func.func @transform_0(%arg0: i32) -> (i32, i32) {
    %c0_i32 = arith.constant 0 : i32
    %c0_i32_0 = arith.constant 0 : i32
    return %arg0, %c0_i32 : i32, i32
  }
  func.func @transform_1(%arg0: i32) -> (i32, i32) {
    %c0_i32 = arith.constant 0 : i32
    %c0_i32_0 = arith.constant 0 : i32
    %c0_i32_1 = arith.constant 0 : i32
    return %c0_i32, %c0_i32_0 : i32, i32
  }
  func.func @transform_2(%arg0: i32) -> (i32, i32) {
    %c0_i32 = arith.constant 0 : i32
    %c0_i32_0 = arith.constant 0 : i32
    %c0_i32_1 = arith.constant 0 : i32
    return %c0_i32, %c0_i32_0 : i32, i32
  }
  func.func @transform_3(%arg0: i32) -> (i32, i32, i32) {
    %c0_i32 = arith.constant 0 : i32
    %c0_i32_0 = arith.constant 0 : i32
    %c0_i32_1 = arith.constant 0 : i32
    %c0_i32_2 = arith.constant 0 : i32
    return %c0_i32, %c0_i32_0, %c0_i32_1 : i32, i32, i32
  }
  func.func @transform_4(%arg0: i32) -> (i32, i32, i32) {
    %c0_i32 = arith.constant 0 : i32
    %c0_i32_0 = arith.constant 0 : i32
    %c0_i32_1 = arith.constant 0 : i32
    %c0_i32_2 = arith.constant 0 : i32
    return %c0_i32, %c0_i32_0, %c0_i32_1 : i32, i32, i32
  }
  func.func @transform_5(%arg0: i32) -> (i32, i32, i32) {
    %c0_i32 = arith.constant 0 : i32
    %c0_i32_0 = arith.constant 0 : i32
    %c0_i32_1 = arith.constant 0 : i32
    %c0_i32_2 = arith.constant 0 : i32
    return %c0_i32, %c0_i32_0, %c0_i32_1 : i32, i32, i32
  }
  func.func @transform_6(%arg0: i32) -> (i32, i32, i32) {
    %c0_i32 = arith.constant 0 : i32
    %c0_i32_0 = arith.constant 0 : i32
    %c0_i32_1 = arith.constant 0 : i32
    %c0_i32_2 = arith.constant 0 : i32
    return %c0_i32, %c0_i32_0, %c0_i32_1 : i32, i32, i32
  }
  func.func @transform_7(%arg0: i32) -> (i32, i32) {
    %c0_i32 = arith.constant 0 : i32
    %c0_i32_0 = arith.constant 0 : i32
    %c0_i32_1 = arith.constant 0 : i32
    return %c0_i32, %c0_i32_0 : i32, i32
  }
  func.func @transform_8(%arg0: i32) -> (i32, i32) {
    %c0_i32 = arith.constant 0 : i32
    %c0_i32_0 = arith.constant 0 : i32
    %c0_i32_1 = arith.constant 0 : i32
    return %c0_i32, %c0_i32_0 : i32, i32
  }
  func.func @transform_9(%arg0: i32) -> (i32, i32) {
    %c0_i32 = arith.constant 0 : i32
    %c0_i32_0 = arith.constant 0 : i32
    return %arg0, %c0_i32 : i32, i32
  }
}

module attributes {stable_mosaic.version = 11 : i64} {
  func.func @resmlp_kernel(%arg0: i32, %arg1: memref<16x128xbf16, #tpu.memory_space<vmem>>, %arg2: memref<128x128xbf16, #tpu.memory_space<vmem>>, %arg3: memref<1x128xf32, #tpu.memory_space<vmem>>, %arg4: memref<3x128x128xbf16, #tpu.memory_space<vmem>>, %arg5: memref<3x1x128xf32, #tpu.memory_space<vmem>>, %arg6: memref<3x1x128xf32, #tpu.memory_space<vmem>>, %arg7: memref<3x1x128xf32, #tpu.memory_space<vmem>>, %arg8: memref<128x128xbf16, #tpu.memory_space<vmem>>, %arg9: memref<1x128xf32, #tpu.memory_space<vmem>>, %arg10: memref<16x128xf32, #tpu.memory_space<vmem>>, %arg11: memref<16x128xf32, #tpu.memory_space<vmem>>) attributes {dimension_semantics = [#tpu.dimension_semantics<parallel>], iteration_bounds = array<i64: 1>, scalar_prefetch = 0 : i64, scratch_operands = 1 : i64, tpu.core_type = #tpu.core_type<tc>, window_params = [{transform_indices = @transform_0, window_bounds = array<i64: 16, 128>}, {pipeline_mode = #tpu.pipeline_mode<synchronous>, transform_indices = @transform_1, window_bounds = array<i64: 128, 128>}, {pipeline_mode = #tpu.pipeline_mode<synchronous>, transform_indices = @transform_2, window_bounds = array<i64: 1, 128>}, {pipeline_mode = #tpu.pipeline_mode<synchronous>, transform_indices = @transform_3, window_bounds = array<i64: 3, 128, 128>}, {pipeline_mode = #tpu.pipeline_mode<synchronous>, transform_indices = @transform_4, window_bounds = array<i64: 3, 1, 128>}, {pipeline_mode = #tpu.pipeline_mode<synchronous>, transform_indices = @transform_5, window_bounds = array<i64: 3, 1, 128>}, {pipeline_mode = #tpu.pipeline_mode<synchronous>, transform_indices = @transform_6, window_bounds = array<i64: 3, 1, 128>}, {pipeline_mode = #tpu.pipeline_mode<synchronous>, transform_indices = @transform_7, window_bounds = array<i64: 128, 128>}, {pipeline_mode = #tpu.pipeline_mode<synchronous>, transform_indices = @transform_8, window_bounds = array<i64: 1, 128>}, {transform_indices = @transform_9, window_bounds = array<i64: 16, 128>}]} {
    %c0 = arith.constant 0 : index
    %c0_0 = arith.constant 0 : index
    %0 = vector.load %arg1[%c0, %c0_0] : memref<16x128xbf16, #tpu.memory_space<vmem>>, vector<16x128xbf16>
    %c0_1 = arith.constant 0 : index
    %c0_2 = arith.constant 0 : index
    %1 = vector.load %arg2[%c0_1, %c0_2] : memref<128x128xbf16, #tpu.memory_space<vmem>>, vector<128x128xbf16>
    %cst = arith.constant dense<0.000000e+00> : vector<16x128xf32>
    %2 = tpu.matmul %0, %1, %cst {dimension_numbers = #tpu.dot_dimension_numbers<[1], [0], [0], [1], [0, 0, 1, 1], [], []>} : vector<16x128xbf16>, vector<128x128xbf16>, vector<16x128xf32> -> vector<16x128xf32>
    %c0_3 = arith.constant 0 : index
    %c0_4 = arith.constant 0 : index
    %3 = vector.load %arg3[%c0_3, %c0_4] : memref<1x128xf32, #tpu.memory_space<vmem>>, vector<1x128xf32>
    %4 = vector.broadcast %3 : vector<1x128xf32> to vector<16x128xf32>
    %5 = arith.addf %2, %4 : vector<16x128xf32>
    %c0_5 = arith.constant 0 : index
    %c0_6 = arith.constant 0 : index
    %6 = vector.load %arg11[%c0_5, %c0_6] : memref<16x128xf32, #tpu.memory_space<vmem>>, vector<16x128xf32>
    tpu.vector_store %arg11[%c0_5, %c0_6], %5 {strides = array<i32>} : memref<16x128xf32, #tpu.memory_space<vmem>>, vector<16x128xf32>,
    %c0_7 = arith.constant 0 : index
    %c0_8 = arith.constant 0 : index
    %7 = vector.load %arg11[%c0_7, %c0_8] : memref<16x128xf32, #tpu.memory_space<vmem>>, vector<16x128xf32>
    %cst_9 = arith.constant dense<0.000000e+00> : vector<16xf32>
    %8 = vector.multi_reduction <add>, %7, %cst_9 [1] : vector<16x128xf32> to vector<16xf32>
    %9 = vector.shape_cast %8 : vector<16xf32> to vector<16x1xf32>
    %10 = arith.mulf %7, %7 : vector<16x128xf32>
    %cst_10 = arith.constant dense<0.000000e+00> : vector<16xf32>
    %11 = vector.multi_reduction <add>, %10, %cst_10 [1] : vector<16x128xf32> to vector<16xf32>
    %12 = vector.shape_cast %11 : vector<16xf32> to vector<16x1xf32>
    %cst_11 = arith.constant 3.125000e-02 : f32
    %13 = vector.broadcast %cst_11 : f32 to vector<16x1xf32>
    %14 = arith.mulf %9, %13 : vector<16x1xf32>
    %cst_12 = arith.constant 3.125000e-02 : f32
    %15 = vector.broadcast %cst_12 : f32 to vector<16x1xf32>
    %16 = arith.mulf %12, %15 : vector<16x1xf32>
    %17 = arith.mulf %14, %14 : vector<16x1xf32>
    %18 = arith.subf %16, %17 : vector<16x1xf32>
    %19 = vector.broadcast %14 : vector<16x1xf32> to vector<16x128xf32>
    %20 = arith.subf %7, %19 : vector<16x128xf32>
    %cst_13 = arith.constant 9.99999974E-6 : f32
    %21 = vector.broadcast %cst_13 : f32 to vector<16x1xf32>
    %22 = arith.addf %18, %21 : vector<16x1xf32>
    %23 = math.rsqrt %22 : vector<16x1xf32>
    %24 = vector.broadcast %23 : vector<16x1xf32> to vector<16x128xf32>
    %25 = arith.mulf %20, %24 : vector<16x128xf32>
    %c0_14 = arith.constant 0 : index
    %c0_15 = arith.constant 0 : index
    %c0_16 = arith.constant 0 : index
    %26 = vector.load %arg6[%c0_14, %c0_15, %c0_16] : memref<3x1x128xf32, #tpu.memory_space<vmem>>, vector<1x1x128xf32>
    %27 = vector.shape_cast %26 : vector<1x1x128xf32> to vector<1x128xf32>
    %28 = vector.broadcast %27 : vector<1x128xf32> to vector<16x128xf32>
    %29 = arith.mulf %25, %28 : vector<16x128xf32>
    %c0_17 = arith.constant 0 : index
    %c0_18 = arith.constant 0 : index
    %c0_19 = arith.constant 0 : index
    %30 = vector.load %arg7[%c0_17, %c0_18, %c0_19] : memref<3x1x128xf32, #tpu.memory_space<vmem>>, vector<1x1x128xf32>
    %31 = vector.shape_cast %30 : vector<1x1x128xf32> to vector<1x128xf32>
    %32 = vector.broadcast %31 : vector<1x128xf32> to vector<16x128xf32>
    %33 = arith.addf %29, %32 : vector<16x128xf32>
    %34 = arith.truncf %33 : vector<16x128xf32> to vector<16x128xbf16>
    %c0_20 = arith.constant 0 : index
    %c0_21 = arith.constant 0 : index
    %c0_22 = arith.constant 0 : index
    %35 = vector.load %arg4[%c0_20, %c0_21, %c0_22] : memref<3x128x128xbf16, #tpu.memory_space<vmem>>, vector<1x128x128xbf16>
    %36 = vector.shape_cast %35 : vector<1x128x128xbf16> to vector<128x128xbf16>
    %cst_23 = arith.constant dense<0.000000e+00> : vector<16x128xf32>
    %37 = tpu.matmul %34, %36, %cst_23 {dimension_numbers = #tpu.dot_dimension_numbers<[1], [0], [0], [1], [0, 0, 1, 1], [], []>} : vector<16x128xbf16>, vector<128x128xbf16>, vector<16x128xf32> -> vector<16x128xf32>
    %c0_24 = arith.constant 0 : index
    %c0_25 = arith.constant 0 : index
    %c0_26 = arith.constant 0 : index
    %38 = vector.load %arg5[%c0_24, %c0_25, %c0_26] : memref<3x1x128xf32, #tpu.memory_space<vmem>>, vector<1x1x128xf32>
    %39 = vector.shape_cast %38 : vector<1x1x128xf32> to vector<1x128xf32>
    %40 = vector.broadcast %39 : vector<1x128xf32> to vector<16x128xf32>
    %41 = arith.addf %37, %40 : vector<16x128xf32>
    %cst_27 = arith.constant 5.000000e-01 : f32
    %42 = vector.broadcast %cst_27 : f32 to vector<16x128xf32>
    %43 = arith.mulf %42, %41 : vector<16x128xf32>
    %cst_28 = arith.constant 0.707106769 : f32
    %44 = vector.broadcast %cst_28 : f32 to vector<16x128xf32>
    %45 = arith.mulf %41, %44 : vector<16x128xf32>
    %46 = math.erf %45 : vector<16x128xf32>
    %cst_29 = arith.constant 1.000000e+00 : f32
    %47 = vector.broadcast %cst_29 : f32 to vector<16x128xf32>
    %48 = arith.addf %47, %46 : vector<16x128xf32>
    %49 = arith.mulf %43, %48 : vector<16x128xf32>
    %50 = arith.addf %7, %49 : vector<16x128xf32>
    %c0_30 = arith.constant 0 : index
    %c0_31 = arith.constant 0 : index
    %51 = vector.load %arg11[%c0_30, %c0_31] : memref<16x128xf32, #tpu.memory_space<vmem>>, vector<16x128xf32>
    tpu.vector_store %arg11[%c0_30, %c0_31], %50 {strides = array<i32>} : memref<16x128xf32, #tpu.memory_space<vmem>>, vector<16x128xf32>,
    %c0_32 = arith.constant 0 : index
    %c0_33 = arith.constant 0 : index
    %52 = vector.load %arg11[%c0_32, %c0_33] : memref<16x128xf32, #tpu.memory_space<vmem>>, vector<16x128xf32>
    %cst_34 = arith.constant dense<0.000000e+00> : vector<16xf32>
    %53 = vector.multi_reduction <add>, %52, %cst_34 [1] : vector<16x128xf32> to vector<16xf32>
    %54 = vector.shape_cast %53 : vector<16xf32> to vector<16x1xf32>
    %55 = arith.mulf %52, %52 : vector<16x128xf32>
    %cst_35 = arith.constant dense<0.000000e+00> : vector<16xf32>
    %56 = vector.multi_reduction <add>, %55, %cst_35 [1] : vector<16x128xf32> to vector<16xf32>
    %57 = vector.shape_cast %56 : vector<16xf32> to vector<16x1xf32>
    %cst_36 = arith.constant 3.125000e-02 : f32
    %58 = vector.broadcast %cst_36 : f32 to vector<16x1xf32>
    %59 = arith.mulf %54, %58 : vector<16x1xf32>
    %cst_37 = arith.constant 3.125000e-02 : f32
    %60 = vector.broadcast %cst_37 : f32 to vector<16x1xf32>
    %61 = arith.mulf %57, %60 : vector<16x1xf32>
    %62 = arith.mulf %59, %59 : vector<16x1xf32>
    %63 = arith.subf %61, %62 : vector<16x1xf32>
    %64 = vector.broadcast %59 : vector<16x1xf32> to vector<16x128xf32>
    %65 = arith.subf %52, %64 : vector<16x128xf32>
    %cst_38 = arith.constant 9.99999974E-6 : f32
    %66 = vector.broadcast %cst_38 : f32 to vector<16x1xf32>
    %67 = arith.addf %63, %66 : vector<16x1xf32>
    %68 = math.rsqrt %67 : vector<16x1xf32>
    %69 = vector.broadcast %68 : vector<16x1xf32> to vector<16x128xf32>
    %70 = arith.mulf %65, %69 : vector<16x128xf32>
    %c1 = arith.constant 1 : index
    %c0_39 = arith.constant 0 : index
    %c0_40 = arith.constant 0 : index
    %71 = vector.load %arg6[%c1, %c0_39, %c0_40] : memref<3x1x128xf32, #tpu.memory_space<vmem>>, vector<1x1x128xf32>
    %72 = vector.shape_cast %71 : vector<1x1x128xf32> to vector<1x128xf32>
    %73 = vector.broadcast %72 : vector<1x128xf32> to vector<16x128xf32>
    %74 = arith.mulf %70, %73 : vector<16x128xf32>
    %c1_41 = arith.constant 1 : index
    %c0_42 = arith.constant 0 : index
    %c0_43 = arith.constant 0 : index
    %75 = vector.load %arg7[%c1_41, %c0_42, %c0_43] : memref<3x1x128xf32, #tpu.memory_space<vmem>>, vector<1x1x128xf32>
    %76 = vector.shape_cast %75 : vector<1x1x128xf32> to vector<1x128xf32>
    %77 = vector.broadcast %76 : vector<1x128xf32> to vector<16x128xf32>
    %78 = arith.addf %74, %77 : vector<16x128xf32>
    %79 = arith.truncf %78 : vector<16x128xf32> to vector<16x128xbf16>
    %c1_44 = arith.constant 1 : index
    %c0_45 = arith.constant 0 : index
    %c0_46 = arith.constant 0 : index
    %80 = vector.load %arg4[%c1_44, %c0_45, %c0_46] : memref<3x128x128xbf16, #tpu.memory_space<vmem>>, vector<1x128x128xbf16>
    %81 = vector.shape_cast %80 : vector<1x128x128xbf16> to vector<128x128xbf16>
    %cst_47 = arith.constant dense<0.000000e+00> : vector<16x128xf32>
    %82 = tpu.matmul %79, %81, %cst_47 {dimension_numbers = #tpu.dot_dimension_numbers<[1], [0], [0], [1], [0, 0, 1, 1], [], []>} : vector<16x128xbf16>, vector<128x128xbf16>, vector<16x128xf32> -> vector<16x128xf32>
    %c1_48 = arith.constant 1 : index
    %c0_49 = arith.constant 0 : index
    %c0_50 = arith.constant 0 : index
    %83 = vector.load %arg5[%c1_48, %c0_49, %c0_50] : memref<3x1x128xf32, #tpu.memory_space<vmem>>, vector<1x1x128xf32>
    %84 = vector.shape_cast %83 : vector<1x1x128xf32> to vector<1x128xf32>
    %85 = vector.broadcast %84 : vector<1x128xf32> to vector<16x128xf32>
    %86 = arith.addf %82, %85 : vector<16x128xf32>
    %cst_51 = arith.constant 5.000000e-01 : f32
    %87 = vector.broadcast %cst_51 : f32 to vector<16x128xf32>
    %88 = arith.mulf %87, %86 : vector<16x128xf32>
    %cst_52 = arith.constant 0.707106769 : f32
    %89 = vector.broadcast %cst_52 : f32 to vector<16x128xf32>
    %90 = arith.mulf %86, %89 : vector<16x128xf32>
    %91 = math.erf %90 : vector<16x128xf32>
    %cst_53 = arith.constant 1.000000e+00 : f32
    %92 = vector.broadcast %cst_53 : f32 to vector<16x128xf32>
    %93 = arith.addf %92, %91 : vector<16x128xf32>
    %94 = arith.mulf %88, %93 : vector<16x128xf32>
    %95 = arith.addf %52, %94 : vector<16x128xf32>
    %c0_54 = arith.constant 0 : index
    %c0_55 = arith.constant 0 : index
    %96 = vector.load %arg11[%c0_54, %c0_55] : memref<16x128xf32, #tpu.memory_space<vmem>>, vector<16x128xf32>
    tpu.vector_store %arg11[%c0_54, %c0_55], %95 {strides = array<i32>} : memref<16x128xf32, #tpu.memory_space<vmem>>, vector<16x128xf32>,
    %c0_56 = arith.constant 0 : index
    %c0_57 = arith.constant 0 : index
    %97 = vector.load %arg11[%c0_56, %c0_57] : memref<16x128xf32, #tpu.memory_space<vmem>>, vector<16x128xf32>
    %cst_58 = arith.constant dense<0.000000e+00> : vector<16xf32>
    %98 = vector.multi_reduction <add>, %97, %cst_58 [1] : vector<16x128xf32> to vector<16xf32>
    %99 = vector.shape_cast %98 : vector<16xf32> to vector<16x1xf32>
    %100 = arith.mulf %97, %97 : vector<16x128xf32>
    %cst_59 = arith.constant dense<0.000000e+00> : vector<16xf32>
    %101 = vector.multi_reduction <add>, %100, %cst_59 [1] : vector<16x128xf32> to vector<16xf32>
    %102 = vector.shape_cast %101 : vector<16xf32> to vector<16x1xf32>
    %cst_60 = arith.constant 3.125000e-02 : f32
    %103 = vector.broadcast %cst_60 : f32 to vector<16x1xf32>
    %104 = arith.mulf %99, %103 : vector<16x1xf32>
    %cst_61 = arith.constant 3.125000e-02 : f32
    %105 = vector.broadcast %cst_61 : f32 to vector<16x1xf32>
    %106 = arith.mulf %102, %105 : vector<16x1xf32>
    %107 = arith.mulf %104, %104 : vector<16x1xf32>
    %108 = arith.subf %106, %107 : vector<16x1xf32>
    %109 = vector.broadcast %104 : vector<16x1xf32> to vector<16x128xf32>
    %110 = arith.subf %97, %109 : vector<16x128xf32>
    %cst_62 = arith.constant 9.99999974E-6 : f32
    %111 = vector.broadcast %cst_62 : f32 to vector<16x1xf32>
    %112 = arith.addf %108, %111 : vector<16x1xf32>
    %113 = math.rsqrt %112 : vector<16x1xf32>
    %114 = vector.broadcast %113 : vector<16x1xf32> to vector<16x128xf32>
    %115 = arith.mulf %110, %114 : vector<16x128xf32>
    %c2 = arith.constant 2 : index
    %c0_63 = arith.constant 0 : index
    %c0_64 = arith.constant 0 : index
    %116 = vector.load %arg6[%c2, %c0_63, %c0_64] : memref<3x1x128xf32, #tpu.memory_space<vmem>>, vector<1x1x128xf32>
    %117 = vector.shape_cast %116 : vector<1x1x128xf32> to vector<1x128xf32>
    %118 = vector.broadcast %117 : vector<1x128xf32> to vector<16x128xf32>
    %119 = arith.mulf %115, %118 : vector<16x128xf32>
    %c2_65 = arith.constant 2 : index
    %c0_66 = arith.constant 0 : index
    %c0_67 = arith.constant 0 : index
    %120 = vector.load %arg7[%c2_65, %c0_66, %c0_67] : memref<3x1x128xf32, #tpu.memory_space<vmem>>, vector<1x1x128xf32>
    %121 = vector.shape_cast %120 : vector<1x1x128xf32> to vector<1x128xf32>
    %122 = vector.broadcast %121 : vector<1x128xf32> to vector<16x128xf32>
    %123 = arith.addf %119, %122 : vector<16x128xf32>
    %124 = arith.truncf %123 : vector<16x128xf32> to vector<16x128xbf16>
    %c2_68 = arith.constant 2 : index
    %c0_69 = arith.constant 0 : index
    %c0_70 = arith.constant 0 : index
    %125 = vector.load %arg4[%c2_68, %c0_69, %c0_70] : memref<3x128x128xbf16, #tpu.memory_space<vmem>>, vector<1x128x128xbf16>
    %126 = vector.shape_cast %125 : vector<1x128x128xbf16> to vector<128x128xbf16>
    %cst_71 = arith.constant dense<0.000000e+00> : vector<16x128xf32>
    %127 = tpu.matmul %124, %126, %cst_71 {dimension_numbers = #tpu.dot_dimension_numbers<[1], [0], [0], [1], [0, 0, 1, 1], [], []>} : vector<16x128xbf16>, vector<128x128xbf16>, vector<16x128xf32> -> vector<16x128xf32>
    %c2_72 = arith.constant 2 : index
    %c0_73 = arith.constant 0 : index
    %c0_74 = arith.constant 0 : index
    %128 = vector.load %arg5[%c2_72, %c0_73, %c0_74] : memref<3x1x128xf32, #tpu.memory_space<vmem>>, vector<1x1x128xf32>
    %129 = vector.shape_cast %128 : vector<1x1x128xf32> to vector<1x128xf32>
    %130 = vector.broadcast %129 : vector<1x128xf32> to vector<16x128xf32>
    %131 = arith.addf %127, %130 : vector<16x128xf32>
    %cst_75 = arith.constant 5.000000e-01 : f32
    %132 = vector.broadcast %cst_75 : f32 to vector<16x128xf32>
    %133 = arith.mulf %132, %131 : vector<16x128xf32>
    %cst_76 = arith.constant 0.707106769 : f32
    %134 = vector.broadcast %cst_76 : f32 to vector<16x128xf32>
    %135 = arith.mulf %131, %134 : vector<16x128xf32>
    %136 = math.erf %135 : vector<16x128xf32>
    %cst_77 = arith.constant 1.000000e+00 : f32
    %137 = vector.broadcast %cst_77 : f32 to vector<16x128xf32>
    %138 = arith.addf %137, %136 : vector<16x128xf32>
    %139 = arith.mulf %133, %138 : vector<16x128xf32>
    %140 = arith.addf %97, %139 : vector<16x128xf32>
    %c0_78 = arith.constant 0 : index
    %c0_79 = arith.constant 0 : index
    %141 = vector.load %arg11[%c0_78, %c0_79] : memref<16x128xf32, #tpu.memory_space<vmem>>, vector<16x128xf32>
    tpu.vector_store %arg11[%c0_78, %c0_79], %140 {strides = array<i32>} : memref<16x128xf32, #tpu.memory_space<vmem>>, vector<16x128xf32>,
    %c0_80 = arith.constant 0 : index
    %c0_81 = arith.constant 0 : index
    %142 = vector.load %arg11[%c0_80, %c0_81] : memref<16x128xf32, #tpu.memory_space<vmem>>, vector<16x128xf32>
    %143 = arith.truncf %142 : vector<16x128xf32> to vector<16x128xbf16>
    %c0_82 = arith.constant 0 : index
    %c0_83 = arith.constant 0 : index
    %144 = vector.load %arg8[%c0_82, %c0_83] : memref<128x128xbf16, #tpu.memory_space<vmem>>, vector<128x128xbf16>
    %cst_84 = arith.constant dense<0.000000e+00> : vector<16x128xf32>
    %145 = tpu.matmul %143, %144, %cst_84 {dimension_numbers = #tpu.dot_dimension_numbers<[1], [0], [0], [1], [0, 0, 1, 1], [], []>} : vector<16x128xbf16>, vector<128x128xbf16>, vector<16x128xf32> -> vector<16x128xf32>
    %c0_85 = arith.constant 0 : index
    %c0_86 = arith.constant 0 : index
    %146 = vector.load %arg9[%c0_85, %c0_86] : memref<1x128xf32, #tpu.memory_space<vmem>>, vector<1x128xf32>
    %147 = vector.broadcast %146 : vector<1x128xf32> to vector<16x128xf32>
    %148 = arith.addf %145, %147 : vector<16x128xf32>
    %c0_87 = arith.constant 0 : index
    %c0_88 = arith.constant 0 : index
    %149 = vector.load %arg10[%c0_87, %c0_88] : memref<16x128xf32, #tpu.memory_space<vmem>>, vector<16x128xf32>
    tpu.vector_store %arg10[%c0_87, %c0_88], %148 {strides = array<i32>} : memref<16x128xf32, #tpu.memory_space<vmem>>, vector<16x128xf32>,
    return
  }
  func.func @transform_0(%arg0: i32) -> (i32, i32) {
    %c0_i32 = arith.constant 0 : i32
    %c0_i32_0 = arith.constant 0 : i32
    return %arg0, %c0_i32 : i32, i32
  }
  func.func @transform_1(%arg0: i32) -> (i32, i32) {
    %c0_i32 = arith.constant 0 : i32
    %c0_i32_0 = arith.constant 0 : i32
    %c0_i32_1 = arith.constant 0 : i32
    return %c0_i32, %c0_i32_0 : i32, i32
  }
  func.func @transform_2(%arg0: i32) -> (i32, i32) {
    %c0_i32 = arith.constant 0 : i32
    %c0_i32_0 = arith.constant 0 : i32
    %c0_i32_1 = arith.constant 0 : i32
    return %c0_i32, %c0_i32_0 : i32, i32
  }
  func.func @transform_3(%arg0: i32) -> (i32, i32, i32) {
    %c0_i32 = arith.constant 0 : i32
    %c0_i32_0 = arith.constant 0 : i32
    %c0_i32_1 = arith.constant 0 : i32
    %c0_i32_2 = arith.constant 0 : i32
    return %c0_i32, %c0_i32_0, %c0_i32_1 : i32, i32, i32
  }
  func.func @transform_4(%arg0: i32) -> (i32, i32, i32) {
    %c0_i32 = arith.constant 0 : i32
    %c0_i32_0 = arith.constant 0 : i32
    %c0_i32_1 = arith.constant 0 : i32
    %c0_i32_2 = arith.constant 0 : i32
    return %c0_i32, %c0_i32_0, %c0_i32_1 : i32, i32, i32
  }
  func.func @transform_5(%arg0: i32) -> (i32, i32, i32) {
    %c0_i32 = arith.constant 0 : i32
    %c0_i32_0 = arith.constant 0 : i32
    %c0_i32_1 = arith.constant 0 : i32
    %c0_i32_2 = arith.constant 0 : i32
    return %c0_i32, %c0_i32_0, %c0_i32_1 : i32, i32, i32
  }
  func.func @transform_6(%arg0: i32) -> (i32, i32, i32) {
    %c0_i32 = arith.constant 0 : i32
    %c0_i32_0 = arith.constant 0 : i32
    %c0_i32_1 = arith.constant 0 : i32
    %c0_i32_2 = arith.constant 0 : i32
    return %c0_i32, %c0_i32_0, %c0_i32_1 : i32, i32, i32
  }
  func.func @transform_7(%arg0: i32) -> (i32, i32) {
    %c0_i32 = arith.constant 0 : i32
    %c0_i32_0 = arith.constant 0 : i32
    %c0_i32_1 = arith.constant 0 : i32
    return %c0_i32, %c0_i32_0 : i32, i32
  }
  func.func @transform_8(%arg0: i32) -> (i32, i32) {
    %c0_i32 = arith.constant 0 : i32
    %c0_i32_0 = arith.constant 0 : i32
    %c0_i32_1 = arith.constant 0 : i32
    return %c0_i32, %c0_i32_0 : i32, i32
  }
  func.func @transform_9(%arg0: i32) -> (i32, i32) {
    %c0_i32 = arith.constant 0 : i32
    %c0_i32_0 = arith.constant 0 : i32
    return %arg0, %c0_i32 : i32, i32
  }
}

</mosaic_0001>

<bundles_post_ra>
// kernel: tpu_custom_call.1
= control target key start
LH: loop header
LB: loop body
LE: loop exit
PB: predicated region body
PF: predicated region fallthrough
CT: control target
= control target key end

     0   :  { %14 = vsyncpa [#allocation4], 0  ;;  %s1507_s0 = inlined_call_operand.hbm [shape: bf16[16,128], index: 0, kind: input, shape index: {}]   ;;  %s1508_s1 = inlined_call_operand.hbm [shape: bf16[128,128], index: 1, kind: input, shape index: {}]   ;;  %s1509_s2 = inlined_call_operand.hbm [shape: f32[1,128], index: 2, kind: input, shape index: {}]   ;;  %s1510_s3 = inlined_call_operand.hbm [shape: bf16[3,128,128], index: 3, kind: input, shape index: {}]   ;;  %s1511_s4 = inlined_call_operand.vmem [shape: f32[3,1,128], index: 4, kind: input, shape index: {}]   ;;  %s1512_s5 = inlined_call_operand.vmem [shape: f32[3,1,128], index: 5, kind: input, shape index: {}]   ;;  %s1513_s6 = inlined_call_operand.vmem [shape: f32[3,1,128], index: 6, kind: input, shape index: {}]   ;;  %s1514_s7 = inlined_call_operand.hbm [shape: bf16[128,128], index: 7, kind: input, shape index: {}]   ;;  %s1515_s8 = inlined_call_operand.vmem [shape: f32[1,128], index: 8, kind: input, shape index: {}]   ;;  %s1516_s9 = inlined_call_operand.hbm [shape: f32[16,128], index: 9, kind: output, shape index: {}]  }
   0x1   :  { %15 = vsyncpa [#allocation7], 0 }
   0x2   :  { %16 = vsyncpa [#allocation10], 0 }
   0x3   :  { %17 = vsyncpa [#allocation5], 0  ;;  %s1293_s30 = smov [#allocation6]   ;;  %s1294_s11 = smov [#allocation9]  }
   0x4   :  { %s35_s10 = sshll.u32 %s1293_s30, 4  ;;  %s57_s12 = sshll.u32 %s1294_s11, 4  ;;  %s36_s10 = int_to_ptr.vmem [resolvable:$true] %s35_s10  ;;  %s58_s12 = int_to_ptr.vmem [resolvable:$true] %s57_s12 }
   0x5   :  { %s1173_s13 = scalar_lea.vmem %s36_s10, 1024  ;;  %p1178_p1 = scmp.lt.s32.totalorder %s36_s10, %s36_s10 }
   0x6   :  { %p1174_p0 = scmp.ne.s32.totalorder %s36_s10, %s1173_s13  ;;  %p1179_p2 = scmp.lt.s32.totalorder %s1173_s13, %s1173_s13 }
   0x8   :  { %p1180_p3 = por %p1179_p2, %p1178_p1 }
   0xa   :  { %p1181_p4 = pnand %p1180_p3, %p1174_p0 }
   0xc   :  { %1184 = shalt.err (!%p1181_p4)
}
   0xd   :  { %s1295_s14 = smov 64   ;;  %s1296_s15 = smov 4  }
   0xe   :  { %41 = dma.hbm_to_vmem [thread:$0]  %s1508_s1, 1024, %s36_s10, [#allocation7], %s1295_s14, %s1295_s14, %s1296_s15  }
   0xf   :  { %s1193_s18 = scalar_lea.vmem %s58_s12, 3072  ;;  %p1198_p6 = scmp.lt.s32.totalorder %s58_s12, %s58_s12 }
  0x10   :  { %p1194_p5 = scmp.ne.s32.totalorder %s58_s12, %s1193_s18  ;;  %p1199_p7 = scmp.lt.s32.totalorder %s1193_s18, %s1193_s18 }
  0x12   :  { %p1200_p8 = por %p1199_p7, %p1198_p6 }
  0x14   :  { %p1201_p9 = pnand %p1200_p8, %p1194_p5 }
  0x16   :  { %1204 = shalt.err (!%p1201_p9)
}
  0x17   :  { %63 = dma.hbm_to_vmem [thread:$0]  %s1510_s3, 3072, %s58_s12, [#allocation10], %s1295_s14, %s1295_s14, %s1296_s15  }
  0x18   :  { %s1297_s21 = smov [#allocation3]   ;;  %s1298_s23 = smov [#allocation8]  }
  0x19   :  { %s23_s22 = sshll.u32 %s1297_s21, 4  ;;  %s48_s24 = sshll.u32 %s1298_s23, 4  ;;  %s24_s22 = int_to_ptr.vmem [resolvable:$true] %s23_s22  ;;  %s49_s24 = int_to_ptr.vmem [resolvable:$true] %s48_s24 }
  0x1a   :  { %s1213_s1 = scalar_lea.vmem %s24_s22, 128  ;;  %p1218_p11 = scmp.lt.s32.totalorder %s24_s22, %s24_s22 }
  0x1b   :  { %p1214_p10 = scmp.ne.s32.totalorder %s24_s22, %s1213_s1  ;;  %p1219_p12 = scmp.lt.s32.totalorder %s1213_s1, %s1213_s1 }
  0x1d   :  { %p1220_p13 = por %p1219_p12, %p1218_p11 }
  0x1f   :  { %p1221_p0 = pnand %p1220_p13, %p1214_p10 }
  0x21   :  { %1224 = shalt.err (!%p1221_p0)
}
  0x22   :  { %29 = dma.hbm_to_vmem [thread:$0]  %s1507_s0, 128, %s24_s22, [#allocation4], %s1295_s14, %s1295_s14, %s1296_s15  }
  0x23   :  { %s1233_s3 = scalar_lea.vmem %s49_s24, 16  ;;  %s1237_s27 = scalar_lea.vmem %s49_s24, 32 }
  0x24   :  { %p1234_p1 = scmp.ne.s32.totalorder %s49_s24, %s1233_s3  ;;  %p1238_p2 = scmp.lt.s32.totalorder %s49_s24, %s49_s24 }
  0x25   :  { %p1239_p3 = scmp.lt.s32.totalorder %s1237_s27, %s1233_s3 }
  0x27   :  { %p1240_p4 = por %p1239_p3, %p1238_p2 }
  0x29   :  { %p1241_p5 = pnand %p1240_p4, %p1234_p1 }
  0x2b   :  { %1244 = shalt.err (!%p1241_p5)
}
  0x2c   :  { %51 = dma.hbm_to_vmem [thread:$0]  %s1509_s2, 16, %s49_s24, [#allocation7]  }
  0x2d   :  { %s1299_s30 = smov [#allocation11]  }
  0x2e   :  { %s75_s10 = sshll.u32 %s1299_s30, 4  ;;  %s76_s10 = int_to_ptr.vmem [resolvable:$true] %s75_s10 }
  0x2f   :  { %s1253_s11 = scalar_lea.vmem %s76_s10, 1024  ;;  %p1258_p7 = scmp.lt.s32.totalorder %s76_s10, %s76_s10 }
  0x30   :  { %p1254_p6 = scmp.ne.s32.totalorder %s76_s10, %s1253_s11  ;;  %p1259_p8 = scmp.lt.s32.totalorder %s1253_s11, %s1253_s11 }
  0x32   :  { %p1260_p9 = por %p1259_p8, %p1258_p7 }
  0x34   :  { %p1261_p10 = pnand %p1260_p9, %p1254_p6 }
  0x36   :  { %1264 = shalt.err (!%p1261_p10)
}
  0x37   :  { %81 = dma.hbm_to_vmem [thread:$0]  %s1514_s7, 1024, %s76_s10, [#allocation10], %s1295_s14, %s1295_s14, %s1296_s15  }
  0x38   :  { %1285 = dma.done.wait [#allocation4], 128  }
  0x39   :  { %1286 = vsyncadd [#allocation4], 4294967168 }
  0x3a   :  { %1287 = dma.done.wait [#allocation7], 1040  }
  0x3b   :  { %1288 = vsyncadd [#allocation7], 4294966256 }
  0x3c   :  { %1289 = dma.done.wait [#allocation10], 4096  }
  0x3d   :  { %1290 = vsyncadd [#allocation10], 4294963200  ;;  %v1300_v0 = vmov 0.0   ;;  %vm1301_vm0 = vmmov 0   ;;  %v1100_v1 = vld [vmem:[#allocation6 + $0x38] sm:$0xff]   ;;  %v1101_v2 = vld [vmem:[#allocation6 + $0x30] sm:$0xff]  }
  0x3e   :  { %988 = vmatprep.subr.bf16.mxu0 %v1300_v0  ;;  %1004 = vmatprep.mubr.msk.bf16.mxu0 %vm1301_vm0, %v1300_v0  ;;  %v1102_v3 = vld [vmem:[#allocation6 + $0x28] sm:$0xff]   ;;  %v1103_v4 = vld [vmem:[#allocation6 + $0x20] sm:$0xff]   ;;  %v1104_v5 = vld [vmem:[#allocation6 + $0x18] sm:$0xff]   ;;  %s1302_s3 = smov [#allocation12]  }
  0x3f   :  { %1008 = vmatprep.subr.bf16.mxu1 %v1300_v0  ;;  %1024 = vmatprep.mubr.msk.bf16.mxu1 %vm1301_vm0, %v1300_v0  ;;  %v1105_v6 = vld [vmem:[#allocation6 + $0x10] sm:$0xff]   ;;  %v1106_v7 = vld [vmem:[#allocation6 + $0x8] sm:$0xff]   ;;  %v1107_v8 = vld [vmem:[#allocation6] sm:$0xff]   ;;  %s871_s27 = sshll.u32 %s1302_s3, 4  ;;  %s872_s27 = int_to_ptr.vmem [resolvable:$true] %s871_s27 }
  0x40   :  { %989 = vmatpush3.bf16.msra.mxu0 %v1100_v1  ;;  %v1108_v9 = vld [vmem:[#allocation3] sm:$0xff]   ;;  %v885_v10 = vld [vmem:[#allocation8] ss:$0 sm:$0xff]  ;;  %v1111_v21 = vld [vmem:[#allocation9 + $0x28] sm:$0xff]   ;;  %s1265_s28 = scalar_lea.vmem %s872_s27, 256  ;;  %p1270_p12 = scmp.lt.s32.totalorder %s872_s27, %s872_s27 }
  0x41   :  { %990 = vmatprep.subr.bf16.mxu0 %v1300_v0  ;;  %v1109_v19 = vld [vmem:[#allocation9 + $0x38] sm:$0xff]   ;;  %v1110_v20 = vld [vmem:[#allocation9 + $0x30] sm:$0xff]   ;;  %v1112_v22 = vld [vmem:[#allocation9 + $0x20] sm:$0xff]   ;;  %p1266_p11 = scmp.ne.s32.totalorder %s872_s27, %s1265_s28  ;;  %p1271_p13 = scmp.lt.s32.totalorder %s1265_s28, %s1265_s28 }
  0x42   :  { %1009 = vmatpush3.bf16.msra.mxu1 %v1109_v19  ;;  %v1113_v23 = vld [vmem:[#allocation9 + $0x18] sm:$0xff]   ;;  %v1114_v24 = vld [vmem:[#allocation9 + $0x10] sm:$0xff]   ;;  %v1115_v25 = vld [vmem:[#allocation9 + $0x8] sm:$0xff]  }
  0x43   :  { %1010 = vmatprep.subr.bf16.mxu1 %v1300_v0  ;;  %v1116_v26 = vld [vmem:[#allocation9] sm:$0xff]   ;;  %v895_v44 = vld [vmem:[%s1512_s5] ss:$0 sm:$0xff]  ;;  %p1272_p0 = por %p1271_p13, %p1270_p12 }
  0x44   :  { %991 = vmatpush3.bf16.msra.mxu0 %v1101_v2  ;;  %v896_v49 = vld [vmem:[%s1513_s6] ss:$0 sm:$0xff]  ;;  %v1124_v19 = vld [vmem:[#allocation9 + $0x40] sm:$0xff]  }
  0x45   :  { %992 = vmatprep.subr.bf16.mxu0 %v1300_v0  ;;  %v897_v54 = vld [vmem:[%s1511_s4] ss:$0 sm:$0xff]  ;;  %p1273_p1 = pnand %p1272_p0, %p1266_p11 }
  0x46   :  { %1011 = vmatpush3.bf16.msra.mxu1 %v1110_v20 }
  0x47   :  { %1012 = vmatprep.subr.bf16.mxu1 %v1300_v0 }
  0x48   :  { %993 = vmatpush3.bf16.msra.mxu0 %v1102_v3 }
  0x49   :  { %994 = vmatprep.subr.bf16.mxu0 %v1300_v0 }
  0x4a   :  { %1013 = vmatpush3.bf16.msra.mxu1 %v1111_v21 }
  0x4b   :  { %1014 = vmatprep.subr.bf16.mxu1 %v1300_v0 }
  0x4c   :  { %995 = vmatpush3.bf16.msra.mxu0 %v1103_v4 }
  0x4d   :  { %996 = vmatprep.subr.bf16.mxu0 %v1300_v0 }
  0x4e   :  { %1015 = vmatpush3.bf16.msra.mxu1 %v1112_v22 }
  0x4f   :  { %1016 = vmatprep.subr.bf16.mxu1 %v1300_v0 }
  0x50   :  { %997 = vmatpush3.bf16.msra.mxu0 %v1104_v5 }
  0x51   :  { %998 = vmatprep.subr.bf16.mxu0 %v1300_v0 }
  0x52   :  { %1017 = vmatpush3.bf16.msra.mxu1 %v1113_v23 }
  0x53   :  { %1018 = vmatprep.subr.bf16.mxu1 %v1300_v0 }
  0x54   :  { %999 = vmatpush3.bf16.msra.mxu0 %v1105_v6 }
  0x55   :  { %1000 = vmatprep.subr.bf16.mxu0 %v1300_v0 }
  0x56   :  { %1019 = vmatpush3.bf16.msra.mxu1 %v1114_v24 }
  0x57   :  { %1020 = vmatprep.subr.bf16.mxu1 %v1300_v0 }
  0x58   :  { %1001 = vmatpush3.bf16.msra.mxu0 %v1106_v7 }
  0x59   :  { %1002 = vmatprep.subr.bf16.mxu0 %v1300_v0 }
  0x5a   :  { %1021 = vmatpush3.bf16.msra.mxu1 %v1115_v25 }
  0x5b   :  { %1022 = vmatprep.subr.bf16.mxu1 %v1300_v0 }
  0x5c   :  { %1003 = vmatpush3.bf16.msra.mxu0 %v1107_v8 }
  0x5d   :  { %1028 = vmatprep.subr.bf16.mxu0 %v1300_v0 }
  0x5e   :  { %1023 = vmatpush3.bf16.msra.mxu1 %v1116_v26 }
  0x5f   :  { %1005 = vmatmul.mubr.bf16.vlgmr.msra.gmra.mxu0 %v1108_v9  ;;  %1048 = vmatprep.subr.bf16.mxu1 %v1300_v0 }
  0x60   :  { %1044 = vmatprep.mubr.msk.bf16.mxu0 %vm1301_vm0, %v1300_v0 }
 0x11f   :  { %v213_v11 = vpop.f32.mrf.mxu0 }
 0x120   :  { %v1398_v12 = vadd.f32 %v885_v10, %v213_v11 }
 0x121   :  { %v1006_v13 = vpop.f32.mrf.mxu0 }
 0x122   :  { %224 = vadd.xlane.f32.xlu0 %v1398_v12  ;;  %v228_v14 = vmul.f32 %v1398_v12, %v1398_v12  ;;  %v1118_v13 = vld [vmem:[#allocation9 + $0x70] sm:$0xff]  }
 0x123   :  { %v216_v15 = vpop.f32.mrf.mxu0 }
 0x124   :  { %v1403_v16 = vadd.f32 %v885_v10, %v216_v15  ;;  %230 = vadd.xlane.f32.xlu1 %v228_v14  ;;  %v1119_v14 = vld [vmem:[#allocation9 + $0x68] sm:$0xff]   ;;  %v1120_v15 = vld [vmem:[#allocation9 + $0x60] sm:$0xff]  }
 0x125   :  { %v1007_v17 = vpop.f32.mrf.mxu0 }
 0x126   :  { %226 = vadd.xlane.f32.xlu0 %v1403_v16  ;;  %v229_v18 = vmul.f32 %v1403_v16, %v1403_v16  ;;  %v1122_v17 = vld [vmem:[#allocation9 + $0x50] sm:$0xff]  }
 0x128   :  { %232 = vadd.xlane.f32.xlu1 %v229_v18  ;;  %v1123_v18 = vld [vmem:[#allocation9 + $0x48] sm:$0xff]  }
 0x1ab   :  { %v225_v27 = vpop.xlane.xlu0 %224 }
 0x1ac   :  { %v234_v28 = vmul.f32 0.03125, %v225_v27 }
 0x1ad   :  { %v231_v29 = vpop.xlane.xlu1 %230 }
 0x1ae   :  { %v238_v30 = vmul.f32 %v234_v28, %v234_v28  ;;  %v236_v31 = vmul.f32 0.03125, %v231_v29  ;;  %v242_v41 = vsub.f32 %v1398_v12, %v234_v28 }
 0x1af   :  { %v227_v32 = vpop.xlane.xlu0 %226 }
 0x1b0   :  { %v240_v33 = vsub.f32 %v236_v31, %v238_v30  ;;  %v235_v34 = vmul.f32 0.03125, %v227_v32 }
 0x1b1   :  { %v233_v35 = vpop.xlane.xlu1 %232 }
 0x1b2   :  { %v244_v36 = vadd.f32 1e-05, %v240_v33  ;;  %v239_v37 = vmul.f32 %v235_v34, %v235_v34  ;;  %v237_v38 = vmul.f32 0.03125, %v233_v35  ;;  %v243_v45 = vsub.f32 %v1403_v16, %v235_v34 }
 0x1b4   :  { %1141 = vrsqrt.f32 %v244_v36  ;;  %v241_v39 = vsub.f32 %v237_v38, %v239_v37  ;;  %v907_v37 = vld [vmem:[%s1512_s5 + $0x1] ss:$0 sm:$0xff] }
 0x1b6   :  { %v245_v40 = vadd.f32 1e-05, %v241_v39 }
 0x1b8   :  { %1143 = vrsqrt.f32 %v245_v40 }
 0x1c1   :  { %v1142_v42 = vpop.eup %1141 }
 0x1c2   :  { %v248_v43 = vmul.f32 %v1142_v42, %v242_v41  ;;  %v909_v42 = vld [vmem:[%s1513_s6 + $0x1] ss:$0 sm:$0xff] }
 0x1c4   :  { %v257_v48 = vmul.f32 %v895_v44, %v248_v43 }
 0x1c5   :  { %v1144_v46 = vpop.eup %1143 }
 0x1c6   :  { %v249_v47 = vmul.f32 %v1144_v46, %v243_v45  ;;  %v266_v51 = vadd.f32 %v896_v49, %v257_v48 }
 0x1c8   :  { %v258_v50 = vmul.f32 %v895_v44, %v249_v47  ;;  %v911_v47 = vld [vmem:[%s1511_s4 + $0x1] ss:$0 sm:$0xff] }
 0x1ca   :  { %v267_v52 = vadd.f32 %v896_v49, %v258_v50 }
 0x1cc   :  { %v268_v53 = vpack.c.bf16 %v267_v52, %v266_v51 }
 0x1ce   :  { %1025 = vmatmul.mubr.bf16.vlgmr.msra.gmra.mxu1 %v268_v53 }
 0x1cf   :  { %1064 = vmatprep.mubr.msk.bf16.mxu1 %vm1301_vm0, %v1300_v0 }
 0x28e   :  { %v374_v55 = vpop.f32.mrf.mxu1 }
 0x28f   :  { %v375_v56 = vadd.f32 %v897_v54, %v374_v55 }
 0x290   :  { %v1026_v57 = vpop.f32.mrf.mxu1 }
 0x291   :  { %v383_v58 = vmul.f32 0.70710677, %v375_v56  ;;  %v381_v1 = vmul.f32 0.5, %v375_v56 }
 0x292   :  { %v377_v59 = vpop.f32.mrf.mxu1 }
 0x293   :  { %1145 = verf.f32 %v383_v58  ;;  %v378_v60 = vadd.f32 %v897_v54, %v377_v59 }
 0x294   :  { %v1027_v61 = vpop.f32.mrf.mxu1 }
 0x295   :  { %v384_v62 = vmul.f32 0.70710677, %v378_v60  ;;  %v382_v6 = vmul.f32 0.5, %v378_v60 }
 0x297   :  { %1147 = verf.f32 %v384_v62 }
 0x2a0   :  { %v1146_v63 = vpop.eup %1145 }
 0x2a1   :  { %v387_v2 = vadd.f32 1.0, %v1146_v63 }
 0x2a3   :  { %v389_v3 = vmul.f32 %v387_v2, %v381_v1 }
 0x2a4   :  { %v1148_v4 = vpop.eup %1147 }
 0x2a5   :  { %v1430_v5 = vadd.f32 %v389_v3, %v1398_v12  ;;  %v388_v7 = vadd.f32 1.0, %v1148_v4  ;;  %v1117_v12 = vld [vmem:[#allocation9 + $0x78] sm:$0xff]  }
 0x2a6   :  { %1029 = vmatpush3.bf16.msra.mxu0 %v1117_v12  ;;  %v1132_v12 = vld [vmem:[#allocation9 + $0x80] sm:$0xff]  }
 0x2a7   :  { %v390_v8 = vmul.f32 %v388_v7, %v382_v6  ;;  %397 = vadd.xlane.f32.xlu0 %v1430_v5  ;;  %v401_v10 = vmul.f32 %v1430_v5, %v1430_v5  ;;  %1030 = vmatprep.subr.bf16.mxu0 %v1300_v0  ;;  %v1126_v6 = vld [vmem:[#allocation9 + $0xb0] sm:$0xff]   ;;  %v1127_v7 = vld [vmem:[#allocation9 + $0xa8] sm:$0xff]  }
 0x2a9   :  { %v1434_v9 = vadd.f32 %v390_v8, %v1403_v16  ;;  %v1121_v16 = vld [vmem:[#allocation9 + $0x58] sm:$0xff]   ;;  %v1128_v8 = vld [vmem:[#allocation9 + $0xa0] sm:$0xff]  }
 0x2aa   :  { %1031 = vmatpush3.bf16.msra.mxu0 %v1118_v13 }
 0x2ab   :  { %403 = vadd.xlane.f32.xlu0 %v401_v10  ;;  %399 = vadd.xlane.f32.xlu1 %v1434_v9  ;;  %v402_v11 = vmul.f32 %v1434_v9, %v1434_v9  ;;  %v1130_v10 = vld [vmem:[#allocation9 + $0x90] sm:$0xff]  }
 0x2ac   :  { %1032 = vmatprep.subr.bf16.mxu0 %v1300_v0 }
 0x2ae   :  { %1033 = vmatpush3.bf16.msra.mxu0 %v1119_v14 }
 0x2af   :  { %405 = vadd.xlane.f32.xlu1 %v402_v11  ;;  %1034 = vmatprep.subr.bf16.mxu0 %v1300_v0  ;;  %v1131_v11 = vld [vmem:[#allocation9 + $0x88] sm:$0xff]  }
 0x2b2   :  { %1035 = vmatpush3.bf16.msra.mxu0 %v1120_v15 }
 0x2b3   :  { %1036 = vmatprep.subr.bf16.mxu0 %v1300_v0 }
 0x2b6   :  { %1037 = vmatpush3.bf16.msra.mxu0 %v1121_v16 }
 0x2b7   :  { %1038 = vmatprep.subr.bf16.mxu0 %v1300_v0 }
 0x2ba   :  { %1039 = vmatpush3.bf16.msra.mxu0 %v1122_v17 }
 0x2bb   :  { %1040 = vmatprep.subr.bf16.mxu0 %v1300_v0 }
 0x2be   :  { %1041 = vmatpush3.bf16.msra.mxu0 %v1123_v18 }
 0x2bf   :  { %1042 = vmatprep.subr.bf16.mxu0 %v1300_v0 }
 0x2c2   :  { %1043 = vmatpush3.bf16.msra.mxu0 %v1124_v19 }
 0x2c3   :  { %1068 = vmatprep.subr.bf16.mxu0 %v1300_v0 }
 0x330   :  { %v398_v20 = vpop.xlane.xlu0 %397 }
 0x331   :  { %v407_v21 = vmul.f32 0.03125, %v398_v20 }
 0x333   :  { %v411_v24 = vmul.f32 %v407_v21, %v407_v21  ;;  %v415_v34 = vsub.f32 %v1430_v5, %v407_v21 }
 0x334   :  { %v404_v22 = vpop.xlane.xlu0 %403  ;;  %v400_v23 = vpop.xlane.xlu1 %399 }
 0x335   :  { %v409_v25 = vmul.f32 0.03125, %v404_v22  ;;  %v408_v26 = vmul.f32 0.03125, %v400_v23 }
 0x337   :  { %v413_v27 = vsub.f32 %v409_v25, %v411_v24  ;;  %v412_v30 = vmul.f32 %v408_v26, %v408_v26  ;;  %v416_v38 = vsub.f32 %v1434_v9, %v408_v26 }
 0x338   :  { %v406_v28 = vpop.xlane.xlu1 %405 }
 0x339   :  { %v417_v29 = vadd.f32 1e-05, %v413_v27  ;;  %v410_v31 = vmul.f32 0.03125, %v406_v28 }
 0x33b   :  { %1149 = vrsqrt.f32 %v417_v29  ;;  %v414_v32 = vsub.f32 %v410_v31, %v412_v30  ;;  %v921_v30 = vld [vmem:[%s1512_s5 + $0x2] ss:$0 sm:$0xff] }
 0x33d   :  { %v418_v33 = vadd.f32 1e-05, %v414_v32 }
 0x33f   :  { %1151 = vrsqrt.f32 %v418_v33 }
 0x348   :  { %v1150_v35 = vpop.eup %1149 }
 0x349   :  { %v421_v36 = vmul.f32 %v1150_v35, %v415_v34  ;;  %v923_v35 = vld [vmem:[%s1513_s6 + $0x2] ss:$0 sm:$0xff] }
 0x34b   :  { %v431_v41 = vmul.f32 %v907_v37, %v421_v36 }
 0x34c   :  { %v1152_v39 = vpop.eup %1151 }
 0x34d   :  { %v422_v40 = vmul.f32 %v1152_v39, %v416_v38  ;;  %v441_v44 = vadd.f32 %v909_v42, %v431_v41  ;;  %v1134_v41 = vld [vmem:[#allocation11 + $0x30] sm:$0xff]  }
 0x34f   :  { %v432_v43 = vmul.f32 %v907_v37, %v422_v40  ;;  %v1133_v40 = vld [vmem:[#allocation11 + $0x38] sm:$0xff]  }
 0x351   :  { %v442_v45 = vadd.f32 %v909_v42, %v432_v43  ;;  %v1135_v42 = vld [vmem:[#allocation11 + $0x28] sm:$0xff]   ;;  %v1136_v43 = vld [vmem:[#allocation11 + $0x20] sm:$0xff]  }
 0x353   :  { %v443_v46 = vpack.c.bf16 %v442_v45, %v441_v44  ;;  %v1137_v44 = vld [vmem:[#allocation11 + $0x18] sm:$0xff]   ;;  %v1138_v45 = vld [vmem:[#allocation11 + $0x10] sm:$0xff]  }
 0x355   :  { %1045 = vmatmul.mubr.bf16.vlgmr.msra.gmra.mxu0 %v443_v46  ;;  %v1139_v46 = vld [vmem:[#allocation11 + $0x8] sm:$0xff]  }
 0x356   :  { %1084 = vmatprep.mubr.msk.bf16.mxu0 %vm1301_vm0, %v1300_v0  ;;  %1069 = vmatpush3.bf16.msra.mxu0 %v1133_v40 }
 0x357   :  { %1070 = vmatprep.subr.bf16.mxu0 %v1300_v0 }
 0x35a   :  { %1071 = vmatpush3.bf16.msra.mxu0 %v1134_v41 }
 0x35b   :  { %1072 = vmatprep.subr.bf16.mxu0 %v1300_v0 }
 0x35e   :  { %1073 = vmatpush3.bf16.msra.mxu0 %v1135_v42 }
 0x35f   :  { %1074 = vmatprep.subr.bf16.mxu0 %v1300_v0 }
 0x362   :  { %1075 = vmatpush3.bf16.msra.mxu0 %v1136_v43 }
 0x363   :  { %1076 = vmatprep.subr.bf16.mxu0 %v1300_v0 }
 0x366   :  { %1077 = vmatpush3.bf16.msra.mxu0 %v1137_v44 }
 0x367   :  { %1078 = vmatprep.subr.bf16.mxu0 %v1300_v0 }
 0x36a   :  { %1079 = vmatpush3.bf16.msra.mxu0 %v1138_v45 }
 0x36b   :  { %1080 = vmatprep.subr.bf16.mxu0 %v1300_v0 }
 0x36e   :  { %1081 = vmatpush3.bf16.msra.mxu0 %v1139_v46 }
 0x36f   :  { %1082 = vmatprep.subr.bf16.mxu0 %v1300_v0 }
 0x415   :  { %v551_v48 = vpop.f32.mrf.mxu0 }
 0x416   :  { %v552_v49 = vadd.f32 %v911_v47, %v551_v48  ;;  %v925_v48 = vld [vmem:[%s1511_s4 + $0x2] ss:$0 sm:$0xff] }
 0x417   :  { %v1046_v50 = vpop.f32.mrf.mxu0 }
 0x418   :  { %v560_v51 = vmul.f32 0.70710677, %v552_v49  ;;  %v558_v57 = vmul.f32 0.5, %v552_v49 }
 0x419   :  { %v554_v52 = vpop.f32.mrf.mxu0 }
 0x41a   :  { %1153 = verf.f32 %v560_v51  ;;  %v555_v53 = vadd.f32 %v911_v47, %v554_v52  ;;  %v1140_v47 = vld [vmem:[#allocation11] sm:$0xff]  }
 0x41b   :  { %v1047_v54 = vpop.f32.mrf.mxu0  ;;  %1083 = vmatpush3.bf16.msra.mxu0 %v1140_v47 }
 0x41c   :  { %v561_v55 = vmul.f32 0.70710677, %v555_v53  ;;  %v559_v62 = vmul.f32 0.5, %v555_v53 }
 0x41e   :  { %1155 = verf.f32 %v561_v55 }
 0x427   :  { %v1154_v56 = vpop.eup %1153 }
 0x428   :  { %v564_v58 = vadd.f32 1.0, %v1154_v56 }
 0x42a   :  { %v566_v59 = vmul.f32 %v564_v58, %v558_v57 }
 0x42b   :  { %v1156_v60 = vpop.eup %1155 }
 0x42c   :  { %v1463_v61 = vadd.f32 %v566_v59, %v1430_v5  ;;  %v565_v63 = vadd.f32 1.0, %v1156_v60  ;;  %v1125_v5 = vld [vmem:[#allocation9 + $0xb8] sm:$0xff]  }
 0x42d   :  { %1049 = vmatpush3.bf16.msra.mxu1 %v1125_v5 }
 0x42e   :  { %v567_v1 = vmul.f32 %v565_v63, %v559_v62  ;;  %574 = vadd.xlane.f32.xlu0 %v1463_v61  ;;  %v578_v3 = vmul.f32 %v1463_v61, %v1463_v61  ;;  %1050 = vmatprep.subr.bf16.mxu1 %v1300_v0 }
 0x430   :  { %v1467_v2 = vadd.f32 %v567_v1, %v1434_v9  ;;  %v1129_v9 = vld [vmem:[#allocation9 + $0x98] sm:$0xff]  }
 0x431   :  { %1051 = vmatpush3.bf16.msra.mxu1 %v1126_v6  ;;  %v934_v6 = vld [vmem:[%s1515_s8] ss:$0 sm:$0xff] }
 0x432   :  { %580 = vadd.xlane.f32.xlu0 %v578_v3  ;;  %576 = vadd.xlane.f32.xlu1 %v1467_v2  ;;  %v579_v4 = vmul.f32 %v1467_v2, %v1467_v2 }
 0x433   :  { %1052 = vmatprep.subr.bf16.mxu1 %v1300_v0 }
 0x435   :  { %1053 = vmatpush3.bf16.msra.mxu1 %v1127_v7 }
 0x436   :  { %582 = vadd.xlane.f32.xlu1 %v579_v4  ;;  %1054 = vmatprep.subr.bf16.mxu1 %v1300_v0 }
 0x439   :  { %1055 = vmatpush3.bf16.msra.mxu1 %v1128_v8 }
 0x43a   :  { %1056 = vmatprep.subr.bf16.mxu1 %v1300_v0 }
 0x43d   :  { %1057 = vmatpush3.bf16.msra.mxu1 %v1129_v9 }
 0x43e   :  { %1058 = vmatprep.subr.bf16.mxu1 %v1300_v0 }
 0x441   :  { %1059 = vmatpush3.bf16.msra.mxu1 %v1130_v10 }
 0x442   :  { %1060 = vmatprep.subr.bf16.mxu1 %v1300_v0 }
 0x445   :  { %1061 = vmatpush3.bf16.msra.mxu1 %v1131_v11 }
 0x446   :  { %1062 = vmatprep.subr.bf16.mxu1 %v1300_v0 }
 0x449   :  { %1063 = vmatpush3.bf16.msra.mxu1 %v1132_v12 }
 0x4b7   :  { %v575_v13 = vpop.xlane.xlu0 %574 }
 0x4b8   :  { %v584_v14 = vmul.f32 0.03125, %v575_v13 }
 0x4ba   :  { %v588_v17 = vmul.f32 %v584_v14, %v584_v14  ;;  %v592_v27 = vsub.f32 %v1463_v61, %v584_v14 }
 0x4bb   :  { %v581_v15 = vpop.xlane.xlu0 %580  ;;  %v577_v16 = vpop.xlane.xlu1 %576 }
 0x4bc   :  { %v586_v18 = vmul.f32 0.03125, %v581_v15  ;;  %v585_v19 = vmul.f32 0.03125, %v577_v16 }
 0x4be   :  { %v590_v20 = vsub.f32 %v586_v18, %v588_v17  ;;  %v589_v23 = vmul.f32 %v585_v19, %v585_v19  ;;  %v593_v31 = vsub.f32 %v1467_v2, %v585_v19 }
 0x4bf   :  { %v583_v21 = vpop.xlane.xlu1 %582 }
 0x4c0   :  { %v594_v22 = vadd.f32 1e-05, %v590_v20  ;;  %v587_v24 = vmul.f32 0.03125, %v583_v21 }
 0x4c2   :  { %1157 = vrsqrt.f32 %v594_v22  ;;  %v591_v25 = vsub.f32 %v587_v24, %v589_v23 }
 0x4c4   :  { %v595_v26 = vadd.f32 1e-05, %v591_v25 }
 0x4c6   :  { %1159 = vrsqrt.f32 %v595_v26 }
 0x4cf   :  { %v1158_v28 = vpop.eup %1157 }
 0x4d0   :  { %v598_v29 = vmul.f32 %v1158_v28, %v592_v27 }
 0x4d2   :  { %v608_v34 = vmul.f32 %v921_v30, %v598_v29 }
 0x4d3   :  { %v1160_v32 = vpop.eup %1159 }
 0x4d4   :  { %v599_v33 = vmul.f32 %v1160_v32, %v593_v31  ;;  %v618_v37 = vadd.f32 %v923_v35, %v608_v34 }
 0x4d6   :  { %v609_v36 = vmul.f32 %v921_v30, %v599_v33 }
 0x4d8   :  { %v619_v38 = vadd.f32 %v923_v35, %v609_v36 }
 0x4da   :  { %v620_v39 = vpack.c.bf16 %v619_v38, %v618_v37 }
 0x4dc   :  { %1065 = vmatmul.mubr.bf16.vlgmr.msra.gmra.mxu1 %v620_v39 }
 0x59c   :  { %v728_v49 = vpop.f32.mrf.mxu1 }
 0x59d   :  { %v729_v50 = vadd.f32 %v925_v48, %v728_v49 }
 0x59e   :  { %v1066_v51 = vpop.f32.mrf.mxu1 }
 0x59f   :  { %v737_v52 = vmul.f32 0.70710677, %v729_v50  ;;  %v735_v59 = vmul.f32 0.5, %v729_v50 }
 0x5a0   :  { %v731_v53 = vpop.f32.mrf.mxu1 }
 0x5a1   :  { %1161 = verf.f32 %v737_v52  ;;  %v732_v54 = vadd.f32 %v925_v48, %v731_v53 }
 0x5a2   :  { %v1067_v55 = vpop.f32.mrf.mxu1 }
 0x5a3   :  { %v738_v56 = vmul.f32 0.70710677, %v732_v54  ;;  %v736_v62 = vmul.f32 0.5, %v732_v54 }
 0x5a5   :  { %1163 = verf.f32 %v738_v56 }
 0x5ae   :  { %v1162_v57 = vpop.eup %1161 }
 0x5af   :  { %v741_v58 = vadd.f32 1.0, %v1162_v57 }
 0x5b1   :  { %v743_v60 = vmul.f32 %v741_v58, %v735_v59 }
 0x5b2   :  { %v1164_v0 = vpop.eup %1163 }
 0x5b3   :  { %v742_v63 = vadd.f32 1.0, %v1164_v0  ;;  %v745_v3 = vadd.f32 %v743_v60, %v1463_v61 }
 0x5b5   :  { %v744_v1 = vmul.f32 %v742_v63, %v736_v62 }
 0x5b7   :  { %v746_v4 = vadd.f32 %v744_v1, %v1467_v2 }
 0x5b9   :  { %v751_v5 = vpack.c.bf16 %v746_v4, %v745_v3 }
 0x5bb   :  { %1085 = vmatmul.mubr.bf16.vlgmr.msra.gmra.mxu0 %v751_v5 }
 0x67b   :  { %v857_v7 = vpop.f32.mrf.mxu0 }
 0x67c   :  { %v858_v8 = vadd.f32 %v934_v6, %v857_v7 }
 0x67d   :  { %v1086_v9 = vpop.f32.mrf.mxu0 }
 0x67e   :  { %864 = vst [vmem:[#allocation12] sm:$0xff] %v858_v8 }
 0x67f   :  { %v860_v10 = vpop.f32.mrf.mxu0 }
 0x680   :  { %v861_v11 = vadd.f32 %v934_v6, %v860_v10 }
 0x681   :  { %v1087_v12 = vpop.f32.mrf.mxu0 }
 0x682   :  { %865 = vst [vmem:[#allocation12 + $0x8] sm:$0xff] %v861_v11 }
 0x683   :  { %1276 = shalt.err (!%p1273_p1)
}
 0x684   :  { %s1303_s29 = smov 128   ;;  %s1304_s8 = smov 8  }
 0x685   :  { %877 = dma.vmem_to_hbm [thread:$0]  %s872_s27, 256, %s1516_s9, [#allocation5], %s1303_s29, %s1303_s29, %s1304_s8  }
 0x686   :  { %1291 = dma.done.wait [#allocation5], 256  }
 0x687   :  { %1292 = vsyncadd [#allocation5], 4294967040 }
 0x688   :  { %881 = vsyncpa [#allocation4], 1 }
 0x689   :  { %882 = vsyncpa [#allocation7], 1 }
 0x68a   :  { %883 = vsyncpa [#allocation10], 1 }
 0x68b   :  { %884 = vsyncpa [#allocation5], 1 }

// kernel: tpu_custom_call.1
= control target key start
LH: loop header
LB: loop body
LE: loop exit
PB: predicated region body
PF: predicated region fallthrough
CT: control target
= control target key end

     0   :  { %14 = vsyncpa [#allocation4], 0  ;;  %s1507_s0 = inlined_call_operand.hbm [shape: bf16[16,128], index: 0, kind: input, shape index: {}]   ;;  %s1508_s1 = inlined_call_operand.hbm [shape: bf16[128,128], index: 1, kind: input, shape index: {}]   ;;  %s1509_s2 = inlined_call_operand.hbm [shape: f32[1,128], index: 2, kind: input, shape index: {}]   ;;  %s1510_s3 = inlined_call_operand.hbm [shape: bf16[3,128,128], index: 3, kind: input, shape index: {}]   ;;  %s1511_s4 = inlined_call_operand.vmem [shape: f32[3,1,128], index: 4, kind: input, shape index: {}]   ;;  %s1512_s5 = inlined_call_operand.vmem [shape: f32[3,1,128], index: 5, kind: input, shape index: {}]   ;;  %s1513_s6 = inlined_call_operand.vmem [shape: f32[3,1,128], index: 6, kind: input, shape index: {}]   ;;  %s1514_s7 = inlined_call_operand.hbm [shape: bf16[128,128], index: 7, kind: input, shape index: {}]   ;;  %s1515_s8 = inlined_call_operand.vmem [shape: f32[1,128], index: 8, kind: input, shape index: {}]   ;;  %s1516_s9 = inlined_call_operand.hbm [shape: f32[16,128], index: 9, kind: output, shape index: {}]  }
   0x1   :  { %15 = vsyncpa [#allocation7], 0 }
   0x2   :  { %16 = vsyncpa [#allocation10], 0 }
   0x3   :  { %17 = vsyncpa [#allocation5], 0  ;;  %s1293_s30 = smov [#allocation6]   ;;  %s1294_s11 = smov [#allocation9]  }
   0x4   :  { %s35_s10 = sshll.u32 %s1293_s30, 4  ;;  %s57_s12 = sshll.u32 %s1294_s11, 4  ;;  %s36_s10 = int_to_ptr.vmem [resolvable:$true] %s35_s10  ;;  %s58_s12 = int_to_ptr.vmem [resolvable:$true] %s57_s12 }
   0x5   :  { %s1173_s13 = scalar_lea.vmem %s36_s10, 1024  ;;  %p1178_p1 = scmp.lt.s32.totalorder %s36_s10, %s36_s10 }
   0x6   :  { %p1174_p0 = scmp.ne.s32.totalorder %s36_s10, %s1173_s13  ;;  %p1179_p2 = scmp.lt.s32.totalorder %s1173_s13, %s1173_s13 }
   0x8   :  { %p1180_p3 = por %p1179_p2, %p1178_p1 }
   0xa   :  { %p1181_p4 = pnand %p1180_p3, %p1174_p0 }
   0xc   :  { %1184 = shalt.err (!%p1181_p4)
}
   0xd   :  { %s1295_s14 = smov 64   ;;  %s1296_s15 = smov 4  }
   0xe   :  { %41 = dma.hbm_to_vmem [thread:$0]  %s1508_s1, 1024, %s36_s10, [#allocation7], %s1295_s14, %s1295_s14, %s1296_s15  }
   0xf   :  { %s1193_s18 = scalar_lea.vmem %s58_s12, 3072  ;;  %p1198_p6 = scmp.lt.s32.totalorder %s58_s12, %s58_s12 }
  0x10   :  { %p1194_p5 = scmp.ne.s32.totalorder %s58_s12, %s1193_s18  ;;  %p1199_p7 = scmp.lt.s32.totalorder %s1193_s18, %s1193_s18 }
  0x12   :  { %p1200_p8 = por %p1199_p7, %p1198_p6 }
  0x14   :  { %p1201_p9 = pnand %p1200_p8, %p1194_p5 }
  0x16   :  { %1204 = shalt.err (!%p1201_p9)
}
  0x17   :  { %63 = dma.hbm_to_vmem [thread:$0]  %s1510_s3, 3072, %s58_s12, [#allocation10], %s1295_s14, %s1295_s14, %s1296_s15  }
  0x18   :  { %s1297_s21 = smov [#allocation3]   ;;  %s1298_s23 = smov [#allocation8]  }
  0x19   :  { %s23_s22 = sshll.u32 %s1297_s21, 4  ;;  %s48_s24 = sshll.u32 %s1298_s23, 4  ;;  %s24_s22 = int_to_ptr.vmem [resolvable:$true] %s23_s22  ;;  %s49_s24 = int_to_ptr.vmem [resolvable:$true] %s48_s24 }
  0x1a   :  { %s1213_s1 = scalar_lea.vmem %s24_s22, 128  ;;  %p1218_p11 = scmp.lt.s32.totalorder %s24_s22, %s24_s22 }
  0x1b   :  { %p1214_p10 = scmp.ne.s32.totalorder %s24_s22, %s1213_s1  ;;  %p1219_p12 = scmp.lt.s32.totalorder %s1213_s1, %s1213_s1 }
  0x1d   :  { %p1220_p13 = por %p1219_p12, %p1218_p11 }
  0x1f   :  { %p1221_p0 = pnand %p1220_p13, %p1214_p10 }
  0x21   :  { %1224 = shalt.err (!%p1221_p0)
}
  0x22   :  { %29 = dma.hbm_to_vmem [thread:$0]  %s1507_s0, 128, %s24_s22, [#allocation4], %s1295_s14, %s1295_s14, %s1296_s15  }
  0x23   :  { %s1233_s3 = scalar_lea.vmem %s49_s24, 16  ;;  %s1237_s27 = scalar_lea.vmem %s49_s24, 32 }
  0x24   :  { %p1234_p1 = scmp.ne.s32.totalorder %s49_s24, %s1233_s3  ;;  %p1238_p2 = scmp.lt.s32.totalorder %s49_s24, %s49_s24 }
  0x25   :  { %p1239_p3 = scmp.lt.s32.totalorder %s1237_s27, %s1233_s3 }
  0x27   :  { %p1240_p4 = por %p1239_p3, %p1238_p2 }
  0x29   :  { %p1241_p5 = pnand %p1240_p4, %p1234_p1 }
  0x2b   :  { %1244 = shalt.err (!%p1241_p5)
}
  0x2c   :  { %51 = dma.hbm_to_vmem [thread:$0]  %s1509_s2, 16, %s49_s24, [#allocation7]  }
  0x2d   :  { %s1299_s30 = smov [#allocation11]  }
  0x2e   :  { %s75_s10 = sshll.u32 %s1299_s30, 4  ;;  %s76_s10 = int_to_ptr.vmem [resolvable:$true] %s75_s10 }
  0x2f   :  { %s1253_s11 = scalar_lea.vmem %s76_s10, 1024  ;;  %p1258_p7 = scmp.lt.s32.totalorder %s76_s10, %s76_s10 }
  0x30   :  { %p1254_p6 = scmp.ne.s32.totalorder %s76_s10, %s1253_s11  ;;  %p1259_p8 = scmp.lt.s32.totalorder %s1253_s11, %s1253_s11 }
  0x32   :  { %p1260_p9 = por %p1259_p8, %p1258_p7 }
  0x34   :  { %p1261_p10 = pnand %p1260_p9, %p1254_p6 }
  0x36   :  { %1264 = shalt.err (!%p1261_p10)
}
  0x37   :  { %81 = dma.hbm_to_vmem [thread:$0]  %s1514_s7, 1024, %s76_s10, [#allocation10], %s1295_s14, %s1295_s14, %s1296_s15  }
  0x38   :  { %1285 = dma.done.wait [#allocation4], 128  }
  0x39   :  { %1286 = vsyncadd [#allocation4], 4294967168 }
  0x3a   :  { %1287 = dma.done.wait [#allocation7], 1040  }
  0x3b   :  { %1288 = vsyncadd [#allocation7], 4294966256 }
  0x3c   :  { %1289 = dma.done.wait [#allocation10], 4096  }
  0x3d   :  { %1290 = vsyncadd [#allocation10], 4294963200  ;;  %v1300_v0 = vmov 0.0   ;;  %vm1301_vm0 = vmmov 0   ;;  %v1100_v1 = vld [vmem:[#allocation6 + $0x38] sm:$0xff]   ;;  %v1101_v2 = vld [vmem:[#allocation6 + $0x30] sm:$0xff]  }
  0x3e   :  { %988 = vmatprep.subr.bf16.mxu0 %v1300_v0  ;;  %1004 = vmatprep.mubr.msk.bf16.mxu0 %vm1301_vm0, %v1300_v0  ;;  %v1102_v3 = vld [vmem:[#allocation6 + $0x28] sm:$0xff]   ;;  %v1103_v4 = vld [vmem:[#allocation6 + $0x20] sm:$0xff]   ;;  %v1104_v5 = vld [vmem:[#allocation6 + $0x18] sm:$0xff]   ;;  %s1302_s3 = smov [#allocation12]  }
  0x3f   :  { %1008 = vmatprep.subr.bf16.mxu1 %v1300_v0  ;;  %1024 = vmatprep.mubr.msk.bf16.mxu1 %vm1301_vm0, %v1300_v0  ;;  %v1105_v6 = vld [vmem:[#allocation6 + $0x10] sm:$0xff]   ;;  %v1106_v7 = vld [vmem:[#allocation6 + $0x8] sm:$0xff]   ;;  %v1107_v8 = vld [vmem:[#allocation6] sm:$0xff]   ;;  %s871_s27 = sshll.u32 %s1302_s3, 4  ;;  %s872_s27 = int_to_ptr.vmem [resolvable:$true] %s871_s27 }
  0x40   :  { %989 = vmatpush3.bf16.msra.mxu0 %v1100_v1  ;;  %v1108_v9 = vld [vmem:[#allocation3] sm:$0xff]   ;;  %v885_v10 = vld [vmem:[#allocation8] ss:$0 sm:$0xff]  ;;  %v1111_v21 = vld [vmem:[#allocation9 + $0x28] sm:$0xff]   ;;  %s1265_s28 = scalar_lea.vmem %s872_s27, 256  ;;  %p1270_p12 = scmp.lt.s32.totalorder %s872_s27, %s872_s27 }
  0x41   :  { %990 = vmatprep.subr.bf16.mxu0 %v1300_v0  ;;  %v1109_v19 = vld [vmem:[#allocation9 + $0x38] sm:$0xff]   ;;  %v1110_v20 = vld [vmem:[#allocation9 + $0x30] sm:$0xff]   ;;  %v1112_v22 = vld [vmem:[#allocation9 + $0x20] sm:$0xff]   ;;  %p1266_p11 = scmp.ne.s32.totalorder %s872_s27, %s1265_s28  ;;  %p1271_p13 = scmp.lt.s32.totalorder %s1265_s28, %s1265_s28 }
  0x42   :  { %1009 = vmatpush3.bf16.msra.mxu1 %v1109_v19  ;;  %v1113_v23 = vld [vmem:[#allocation9 + $0x18] sm:$0xff]   ;;  %v1114_v24 = vld [vmem:[#allocation9 + $0x10] sm:$0xff]   ;;  %v1115_v25 = vld [vmem:[#allocation9 + $0x8] sm:$0xff]  }
  0x43   :  { %1010 = vmatprep.subr.bf16.mxu1 %v1300_v0  ;;  %v1116_v26 = vld [vmem:[#allocation9] sm:$0xff]   ;;  %v895_v44 = vld [vmem:[%s1512_s5] ss:$0 sm:$0xff]  ;;  %p1272_p0 = por %p1271_p13, %p1270_p12 }
  0x44   :  { %991 = vmatpush3.bf16.msra.mxu0 %v1101_v2  ;;  %v896_v49 = vld [vmem:[%s1513_s6] ss:$0 sm:$0xff]  ;;  %v1124_v19 = vld [vmem:[#allocation9 + $0x40] sm:$0xff]  }
  0x45   :  { %992 = vmatprep.subr.bf16.mxu0 %v1300_v0  ;;  %v897_v54 = vld [vmem:[%s1511_s4] ss:$0 sm:$0xff]  ;;  %p1273_p1 = pnand %p1272_p0, %p1266_p11 }
  0x46   :  { %1011 = vmatpush3.bf16.msra.mxu1 %v1110_v20 }
  0x47   :  { %1012 = vmatprep.subr.bf16.mxu1 %v1300_v0 }
  0x48   :  { %993 = vmatpush3.bf16.msra.mxu0 %v1102_v3 }
  0x49   :  { %994 = vmatprep.subr.bf16.mxu0 %v1300_v0 }
  0x4a   :  { %1013 = vmatpush3.bf16.msra.mxu1 %v1111_v21 }
  0x4b   :  { %1014 = vmatprep.subr.bf16.mxu1 %v1300_v0 }
  0x4c   :  { %995 = vmatpush3.bf16.msra.mxu0 %v1103_v4 }
  0x4d   :  { %996 = vmatprep.subr.bf16.mxu0 %v1300_v0 }
  0x4e   :  { %1015 = vmatpush3.bf16.msra.mxu1 %v1112_v22 }
  0x4f   :  { %1016 = vmatprep.subr.bf16.mxu1 %v1300_v0 }
  0x50   :  { %997 = vmatpush3.bf16.msra.mxu0 %v1104_v5 }
  0x51   :  { %998 = vmatprep.subr.bf16.mxu0 %v1300_v0 }
  0x52   :  { %1017 = vmatpush3.bf16.msra.mxu1 %v1113_v23 }
  0x53   :  { %1018 = vmatprep.subr.bf16.mxu1 %v1300_v0 }
  0x54   :  { %999 = vmatpush3.bf16.msra.mxu0 %v1105_v6 }
  0x55   :  { %1000 = vmatprep.subr.bf16.mxu0 %v1300_v0 }
  0x56   :  { %1019 = vmatpush3.bf16.msra.mxu1 %v1114_v24 }
  0x57   :  { %1020 = vmatprep.subr.bf16.mxu1 %v1300_v0 }
  0x58   :  { %1001 = vmatpush3.bf16.msra.mxu0 %v1106_v7 }
  0x59   :  { %1002 = vmatprep.subr.bf16.mxu0 %v1300_v0 }
  0x5a   :  { %1021 = vmatpush3.bf16.msra.mxu1 %v1115_v25 }
  0x5b   :  { %1022 = vmatprep.subr.bf16.mxu1 %v1300_v0 }
  0x5c   :  { %1003 = vmatpush3.bf16.msra.mxu0 %v1107_v8 }
  0x5d   :  { %1028 = vmatprep.subr.bf16.mxu0 %v1300_v0 }
  0x5e   :  { %1023 = vmatpush3.bf16.msra.mxu1 %v1116_v26 }
  0x5f   :  { %1005 = vmatmul.mubr.bf16.vlgmr.msra.gmra.mxu0 %v1108_v9  ;;  %1048 = vmatprep.subr.bf16.mxu1 %v1300_v0 }
  0x60   :  { %1044 = vmatprep.mubr.msk.bf16.mxu0 %vm1301_vm0, %v1300_v0 }
 0x11f   :  { %v213_v11 = vpop.f32.mrf.mxu0 }
 0x120   :  { %v1398_v12 = vadd.f32 %v885_v10, %v213_v11 }
 0x121   :  { %v1006_v13 = vpop.f32.mrf.mxu0 }
 0x122   :  { %224 = vadd.xlane.f32.xlu0 %v1398_v12  ;;  %v228_v14 = vmul.f32 %v1398_v12, %v1398_v12  ;;  %v1118_v13 = vld [vmem:[#allocation9 + $0x70] sm:$0xff]  }
 0x123   :  { %v216_v15 = vpop.f32.mrf.mxu0 }
 0x124   :  { %v1403_v16 = vadd.f32 %v885_v10, %v216_v15  ;;  %230 = vadd.xlane.f32.xlu1 %v228_v14  ;;  %v1119_v14 = vld [vmem:[#allocation9 + $0x68] sm:$0xff]   ;;  %v1120_v15 = vld [vmem:[#allocation9 + $0x60] sm:$0xff]  }
 0x125   :  { %v1007_v17 = vpop.f32.mrf.mxu0 }
 0x126   :  { %226 = vadd.xlane.f32.xlu0 %v1403_v16  ;;  %v229_v18 = vmul.f32 %v1403_v16, %v1403_v16  ;;  %v1122_v17 = vld [vmem:[#allocation9 + $0x50] sm:$0xff]  }
 0x128   :  { %232 = vadd.xlane.f32.xlu1 %v229_v18  ;;  %v1123_v18 = vld [vmem:[#allocation9 + $0x48] sm:$0xff]  }
 0x1ab   :  { %v225_v27 = vpop.xlane.xlu0 %224 }
 0x1ac   :  { %v234_v28 = vmul.f32 0.03125, %v225_v27 }
 0x1ad   :  { %v231_v29 = vpop.xlane.xlu1 %230 }
 0x1ae   :  { %v238_v30 = vmul.f32 %v234_v28, %v234_v28  ;;  %v236_v31 = vmul.f32 0.03125, %v231_v29  ;;  %v242_v41 = vsub.f32 %v1398_v12, %v234_v28 }
 0x1af   :  { %v227_v32 = vpop.xlane.xlu0 %226 }
 0x1b0   :  { %v240_v33 = vsub.f32 %v236_v31, %v238_v30  ;;  %v235_v34 = vmul.f32 0.03125, %v227_v32 }
 0x1b1   :  { %v233_v35 = vpop.xlane.xlu1 %232 }
 0x1b2   :  { %v244_v36 = vadd.f32 1e-05, %v240_v33  ;;  %v239_v37 = vmul.f32 %v235_v34, %v235_v34  ;;  %v237_v38 = vmul.f32 0.03125, %v233_v35  ;;  %v243_v45 = vsub.f32 %v1403_v16, %v235_v34 }
 0x1b4   :  { %1141 = vrsqrt.f32 %v244_v36  ;;  %v241_v39 = vsub.f32 %v237_v38, %v239_v37  ;;  %v907_v37 = vld [vmem:[%s1512_s5 + $0x1] ss:$0 sm:$0xff] }
 0x1b6   :  { %v245_v40 = vadd.f32 1e-05, %v241_v39 }
 0x1b8   :  { %1143 = vrsqrt.f32 %v245_v40 }
 0x1c1   :  { %v1142_v42 = vpop.eup %1141 }
 0x1c2   :  { %v248_v43 = vmul.f32 %v1142_v42, %v242_v41  ;;  %v909_v42 = vld [vmem:[%s1513_s6 + $0x1] ss:$0 sm:$0xff] }
 0x1c4   :  { %v257_v48 = vmul.f32 %v895_v44, %v248_v43 }
 0x1c5   :  { %v1144_v46 = vpop.eup %1143 }
 0x1c6   :  { %v249_v47 = vmul.f32 %v1144_v46, %v243_v45  ;;  %v266_v51 = vadd.f32 %v896_v49, %v257_v48 }
 0x1c8   :  { %v258_v50 = vmul.f32 %v895_v44, %v249_v47  ;;  %v911_v47 = vld [vmem:[%s1511_s4 + $0x1] ss:$0 sm:$0xff] }
 0x1ca   :  { %v267_v52 = vadd.f32 %v896_v49, %v258_v50 }
 0x1cc   :  { %v268_v53 = vpack.c.bf16 %v267_v52, %v266_v51 }
 0x1ce   :  { %1025 = vmatmul.mubr.bf16.vlgmr.msra.gmra.mxu1 %v268_v53 }
 0x1cf   :  { %1064 = vmatprep.mubr.msk.bf16.mxu1 %vm1301_vm0, %v1300_v0 }
 0x28e   :  { %v374_v55 = vpop.f32.mrf.mxu1 }
 0x28f   :  { %v375_v56 = vadd.f32 %v897_v54, %v374_v55 }
 0x290   :  { %v1026_v57 = vpop.f32.mrf.mxu1 }
 0x291   :  { %v383_v58 = vmul.f32 0.70710677, %v375_v56  ;;  %v381_v1 = vmul.f32 0.5, %v375_v56 }
 0x292   :  { %v377_v59 = vpop.f32.mrf.mxu1 }
 0x293   :  { %1145 = verf.f32 %v383_v58  ;;  %v378_v60 = vadd.f32 %v897_v54, %v377_v59 }
 0x294   :  { %v1027_v61 = vpop.f32.mrf.mxu1 }
 0x295   :  { %v384_v62 = vmul.f32 0.70710677, %v378_v60  ;;  %v382_v6 = vmul.f32 0.5, %v378_v60 }
 0x297   :  { %1147 = verf.f32 %v384_v62 }
 0x2a0   :  { %v1146_v63 = vpop.eup %1145 }
 0x2a1   :  { %v387_v2 = vadd.f32 1.0, %v1146_v63 }
 0x2a3   :  { %v389_v3 = vmul.f32 %v387_v2, %v381_v1 }
 0x2a4   :  { %v1148_v4 = vpop.eup %1147 }
 0x2a5   :  { %v1430_v5 = vadd.f32 %v389_v3, %v1398_v12  ;;  %v388_v7 = vadd.f32 1.0, %v1148_v4  ;;  %v1117_v12 = vld [vmem:[#allocation9 + $0x78] sm:$0xff]  }
 0x2a6   :  { %1029 = vmatpush3.bf16.msra.mxu0 %v1117_v12  ;;  %v1132_v12 = vld [vmem:[#allocation9 + $0x80] sm:$0xff]  }
 0x2a7   :  { %v390_v8 = vmul.f32 %v388_v7, %v382_v6  ;;  %397 = vadd.xlane.f32.xlu0 %v1430_v5  ;;  %v401_v10 = vmul.f32 %v1430_v5, %v1430_v5  ;;  %1030 = vmatprep.subr.bf16.mxu0 %v1300_v0  ;;  %v1126_v6 = vld [vmem:[#allocation9 + $0xb0] sm:$0xff]   ;;  %v1127_v7 = vld [vmem:[#allocation9 + $0xa8] sm:$0xff]  }
 0x2a9   :  { %v1434_v9 = vadd.f32 %v390_v8, %v1403_v16  ;;  %v1121_v16 = vld [vmem:[#allocation9 + $0x58] sm:$0xff]   ;;  %v1128_v8 = vld [vmem:[#allocation9 + $0xa0] sm:$0xff]  }
 0x2aa   :  { %1031 = vmatpush3.bf16.msra.mxu0 %v1118_v13 }
 0x2ab   :  { %403 = vadd.xlane.f32.xlu0 %v401_v10  ;;  %399 = vadd.xlane.f32.xlu1 %v1434_v9  ;;  %v402_v11 = vmul.f32 %v1434_v9, %v1434_v9  ;;  %v1130_v10 = vld [vmem:[#allocation9 + $0x90] sm:$0xff]  }
 0x2ac   :  { %1032 = vmatprep.subr.bf16.mxu0 %v1300_v0 }
 0x2ae   :  { %1033 = vmatpush3.bf16.msra.mxu0 %v1119_v14 }
 0x2af   :  { %405 = vadd.xlane.f32.xlu1 %v402_v11  ;;  %1034 = vmatprep.subr.bf16.mxu0 %v1300_v0  ;;  %v1131_v11 = vld [vmem:[#allocation9 + $0x88] sm:$0xff]  }
 0x2b2   :  { %1035 = vmatpush3.bf16.msra.mxu0 %v1120_v15 }
 0x2b3   :  { %1036 = vmatprep.subr.bf16.mxu0 %v1300_v0 }
 0x2b6   :  { %1037 = vmatpush3.bf16.msra.mxu0 %v1121_v16 }
 0x2b7   :  { %1038 = vmatprep.subr.bf16.mxu0 %v1300_v0 }
 0x2ba   :  { %1039 = vmatpush3.bf16.msra.mxu0 %v1122_v17 }
 0x2bb   :  { %1040 = vmatprep.subr.bf16.mxu0 %v1300_v0 }
 0x2be   :  { %1041 = vmatpush3.bf16.msra.mxu0 %v1123_v18 }
 0x2bf   :  { %1042 = vmatprep.subr.bf16.mxu0 %v1300_v0 }
 0x2c2   :  { %1043 = vmatpush3.bf16.msra.mxu0 %v1124_v19 }
 0x2c3   :  { %1068 = vmatprep.subr.bf16.mxu0 %v1300_v0 }
 0x330   :  { %v398_v20 = vpop.xlane.xlu0 %397 }
 0x331   :  { %v407_v21 = vmul.f32 0.03125, %v398_v20 }
 0x333   :  { %v411_v24 = vmul.f32 %v407_v21, %v407_v21  ;;  %v415_v34 = vsub.f32 %v1430_v5, %v407_v21 }
 0x334   :  { %v404_v22 = vpop.xlane.xlu0 %403  ;;  %v400_v23 = vpop.xlane.xlu1 %399 }
 0x335   :  { %v409_v25 = vmul.f32 0.03125, %v404_v22  ;;  %v408_v26 = vmul.f32 0.03125, %v400_v23 }
 0x337   :  { %v413_v27 = vsub.f32 %v409_v25, %v411_v24  ;;  %v412_v30 = vmul.f32 %v408_v26, %v408_v26  ;;  %v416_v38 = vsub.f32 %v1434_v9, %v408_v26 }
 0x338   :  { %v406_v28 = vpop.xlane.xlu1 %405 }
 0x339   :  { %v417_v29 = vadd.f32 1e-05, %v413_v27  ;;  %v410_v31 = vmul.f32 0.03125, %v406_v28 }
 0x33b   :  { %1149 = vrsqrt.f32 %v417_v29  ;;  %v414_v32 = vsub.f32 %v410_v31, %v412_v30  ;;  %v921_v30 = vld [vmem:[%s1512_s5 + $0x2] ss:$0 sm:$0xff] }
 0x33d   :  { %v418_v33 = vadd.f32 1e-05, %v414_v32 }
 0x33f   :  { %1151 = vrsqrt.f32 %v418_v33 }
 0x348   :  { %v1150_v35 = vpop.eup %1149 }
 0x349   :  { %v421_v36 = vmul.f32 %v1150_v35, %v415_v34  ;;  %v923_v35 = vld [vmem:[%s1513_s6 + $0x2] ss:$0 sm:$0xff] }
 0x34b   :  { %v431_v41 = vmul.f32 %v907_v37, %v421_v36 }
 0x34c   :  { %v1152_v39 = vpop.eup %1151 }
 0x34d   :  { %v422_v40 = vmul.f32 %v1152_v39, %v416_v38  ;;  %v441_v44 = vadd.f32 %v909_v42, %v431_v41  ;;  %v1134_v41 = vld [vmem:[#allocation11 + $0x30] sm:$0xff]  }
 0x34f   :  { %v432_v43 = vmul.f32 %v907_v37, %v422_v40  ;;  %v1133_v40 = vld [vmem:[#allocation11 + $0x38] sm:$0xff]  }
 0x351   :  { %v442_v45 = vadd.f32 %v909_v42, %v432_v43  ;;  %v1135_v42 = vld [vmem:[#allocation11 + $0x28] sm:$0xff]   ;;  %v1136_v43 = vld [vmem:[#allocation11 + $0x20] sm:$0xff]  }
 0x353   :  { %v443_v46 = vpack.c.bf16 %v442_v45, %v441_v44  ;;  %v1137_v44 = vld [vmem:[#allocation11 + $0x18] sm:$0xff]   ;;  %v1138_v45 = vld [vmem:[#allocation11 + $0x10] sm:$0xff]  }
 0x355   :  { %1045 = vmatmul.mubr.bf16.vlgmr.msra.gmra.mxu0 %v443_v46  ;;  %v1139_v46 = vld [vmem:[#allocation11 + $0x8] sm:$0xff]  }
 0x356   :  { %1084 = vmatprep.mubr.msk.bf16.mxu0 %vm1301_vm0, %v1300_v0  ;;  %1069 = vmatpush3.bf16.msra.mxu0 %v1133_v40 }
 0x357   :  { %1070 = vmatprep.subr.bf16.mxu0 %v1300_v0 }
 0x35a   :  { %1071 = vmatpush3.bf16.msra.mxu0 %v1134_v41 }
 0x35b   :  { %1072 = vmatprep.subr.bf16.mxu0 %v1300_v0 }
 0x35e   :  { %1073 = vmatpush3.bf16.msra.mxu0 %v1135_v42 }
 0x35f   :  { %1074 = vmatprep.subr.bf16.mxu0 %v1300_v0 }
 0x362   :  { %1075 = vmatpush3.bf16.msra.mxu0 %v1136_v43 }
 0x363   :  { %1076 = vmatprep.subr.bf16.mxu0 %v1300_v0 }
 0x366   :  { %1077 = vmatpush3.bf16.msra.mxu0 %v1137_v44 }
 0x367   :  { %1078 = vmatprep.subr.bf16.mxu0 %v1300_v0 }
 0x36a   :  { %1079 = vmatpush3.bf16.msra.mxu0 %v1138_v45 }
 0x36b   :  { %1080 = vmatprep.subr.bf16.mxu0 %v1300_v0 }
 0x36e   :  { %1081 = vmatpush3.bf16.msra.mxu0 %v1139_v46 }
 0x36f   :  { %1082 = vmatprep.subr.bf16.mxu0 %v1300_v0 }
 0x415   :  { %v551_v48 = vpop.f32.mrf.mxu0 }
 0x416   :  { %v552_v49 = vadd.f32 %v911_v47, %v551_v48  ;;  %v925_v48 = vld [vmem:[%s1511_s4 + $0x2] ss:$0 sm:$0xff] }
 0x417   :  { %v1046_v50 = vpop.f32.mrf.mxu0 }
 0x418   :  { %v560_v51 = vmul.f32 0.70710677, %v552_v49  ;;  %v558_v57 = vmul.f32 0.5, %v552_v49 }
 0x419   :  { %v554_v52 = vpop.f32.mrf.mxu0 }
 0x41a   :  { %1153 = verf.f32 %v560_v51  ;;  %v555_v53 = vadd.f32 %v911_v47, %v554_v52  ;;  %v1140_v47 = vld [vmem:[#allocation11] sm:$0xff]  }
 0x41b   :  { %v1047_v54 = vpop.f32.mrf.mxu0  ;;  %1083 = vmatpush3.bf16.msra.mxu0 %v1140_v47 }
 0x41c   :  { %v561_v55 = vmul.f32 0.70710677, %v555_v53  ;;  %v559_v62 = vmul.f32 0.5, %v555_v53 }
 0x41e   :  { %1155 = verf.f32 %v561_v55 }
 0x427   :  { %v1154_v56 = vpop.eup %1153 }
 0x428   :  { %v564_v58 = vadd.f32 1.0, %v1154_v56 }
 0x42a   :  { %v566_v59 = vmul.f32 %v564_v58, %v558_v57 }
 0x42b   :  { %v1156_v60 = vpop.eup %1155 }
 0x42c   :  { %v1463_v61 = vadd.f32 %v566_v59, %v1430_v5  ;;  %v565_v63 = vadd.f32 1.0, %v1156_v60  ;;  %v1125_v5 = vld [vmem:[#allocation9 + $0xb8] sm:$0xff]  }
 0x42d   :  { %1049 = vmatpush3.bf16.msra.mxu1 %v1125_v5 }
 0x42e   :  { %v567_v1 = vmul.f32 %v565_v63, %v559_v62  ;;  %574 = vadd.xlane.f32.xlu0 %v1463_v61  ;;  %v578_v3 = vmul.f32 %v1463_v61, %v1463_v61  ;;  %1050 = vmatprep.subr.bf16.mxu1 %v1300_v0 }
 0x430   :  { %v1467_v2 = vadd.f32 %v567_v1, %v1434_v9  ;;  %v1129_v9 = vld [vmem:[#allocation9 + $0x98] sm:$0xff]  }
 0x431   :  { %1051 = vmatpush3.bf16.msra.mxu1 %v1126_v6  ;;  %v934_v6 = vld [vmem:[%s1515_s8] ss:$0 sm:$0xff] }
 0x432   :  { %580 = vadd.xlane.f32.xlu0 %v578_v3  ;;  %576 = vadd.xlane.f32.xlu1 %v1467_v2  ;;  %v579_v4 = vmul.f32 %v1467_v2, %v1467_v2 }
 0x433   :  { %1052 = vmatprep.subr.bf16.mxu1 %v1300_v0 }
 0x435   :  { %1053 = vmatpush3.bf16.msra.mxu1 %v1127_v7 }
 0x436   :  { %582 = vadd.xlane.f32.xlu1 %v579_v4  ;;  %1054 = vmatprep.subr.bf16.mxu1 %v1300_v0 }
 0x439   :  { %1055 = vmatpush3.bf16.msra.mxu1 %v1128_v8 }
 0x43a   :  { %1056 = vmatprep.subr.bf16.mxu1 %v1300_v0 }
 0x43d   :  { %1057 = vmatpush3.bf16.msra.mxu1 %v1129_v9 }
 0x43e   :  { %1058 = vmatprep.subr.bf16.mxu1 %v1300_v0 }
 0x441   :  { %1059 = vmatpush3.bf16.msra.mxu1 %v1130_v10 }
 0x442   :  { %1060 = vmatprep.subr.bf16.mxu1 %v1300_v0 }
 0x445   :  { %1061 = vmatpush3.bf16.msra.mxu1 %v1131_v11 }
 0x446   :  { %1062 = vmatprep.subr.bf16.mxu1 %v1300_v0 }
 0x449   :  { %1063 = vmatpush3.bf16.msra.mxu1 %v1132_v12 }
 0x4b7   :  { %v575_v13 = vpop.xlane.xlu0 %574 }
 0x4b8   :  { %v584_v14 = vmul.f32 0.03125, %v575_v13 }
 0x4ba   :  { %v588_v17 = vmul.f32 %v584_v14, %v584_v14  ;;  %v592_v27 = vsub.f32 %v1463_v61, %v584_v14 }
 0x4bb   :  { %v581_v15 = vpop.xlane.xlu0 %580  ;;  %v577_v16 = vpop.xlane.xlu1 %576 }
 0x4bc   :  { %v586_v18 = vmul.f32 0.03125, %v581_v15  ;;  %v585_v19 = vmul.f32 0.03125, %v577_v16 }
 0x4be   :  { %v590_v20 = vsub.f32 %v586_v18, %v588_v17  ;;  %v589_v23 = vmul.f32 %v585_v19, %v585_v19  ;;  %v593_v31 = vsub.f32 %v1467_v2, %v585_v19 }
 0x4bf   :  { %v583_v21 = vpop.xlane.xlu1 %582 }
 0x4c0   :  { %v594_v22 = vadd.f32 1e-05, %v590_v20  ;;  %v587_v24 = vmul.f32 0.03125, %v583_v21 }
 0x4c2   :  { %1157 = vrsqrt.f32 %v594_v22  ;;  %v591_v25 = vsub.f32 %v587_v24, %v589_v23 }
 0x4c4   :  { %v595_v26 = vadd.f32 1e-05, %v591_v25 }
 0x4c6   :  { %1159 = vrsqrt.f32 %v595_v26 }
 0x4cf   :  { %v1158_v28 = vpop.eup %1157 }
 0x4d0   :  { %v598_v29 = vmul.f32 %v1158_v28, %v592_v27 }
 0x4d2   :  { %v608_v34 = vmul.f32 %v921_v30, %v598_v29 }
 0x4d3   :  { %v1160_v32 = vpop.eup %1159 }
 0x4d4   :  { %v599_v33 = vmul.f32 %v1160_v32, %v593_v31  ;;  %v618_v37 = vadd.f32 %v923_v35, %v608_v34 }
 0x4d6   :  { %v609_v36 = vmul.f32 %v921_v30, %v599_v33 }
 0x4d8   :  { %v619_v38 = vadd.f32 %v923_v35, %v609_v36 }
 0x4da   :  { %v620_v39 = vpack.c.bf16 %v619_v38, %v618_v37 }
 0x4dc   :  { %1065 = vmatmul.mubr.bf16.vlgmr.msra.gmra.mxu1 %v620_v39 }
 0x59c   :  { %v728_v49 = vpop.f32.mrf.mxu1 }
 0x59d   :  { %v729_v50 = vadd.f32 %v925_v48, %v728_v49 }
 0x59e   :  { %v1066_v51 = vpop.f32.mrf.mxu1 }
 0x59f   :  { %v737_v52 = vmul.f32 0.70710677, %v729_v50  ;;  %v735_v59 = vmul.f32 0.5, %v729_v50 }
 0x5a0   :  { %v731_v53 = vpop.f32.mrf.mxu1 }
 0x5a1   :  { %1161 = verf.f32 %v737_v52  ;;  %v732_v54 = vadd.f32 %v925_v48, %v731_v53 }
 0x5a2   :  { %v1067_v55 = vpop.f32.mrf.mxu1 }
 0x5a3   :  { %v738_v56 = vmul.f32 0.70710677, %v732_v54  ;;  %v736_v62 = vmul.f32 0.5, %v732_v54 }
 0x5a5   :  { %1163 = verf.f32 %v738_v56 }
 0x5ae   :  { %v1162_v57 = vpop.eup %1161 }
 0x5af   :  { %v741_v58 = vadd.f32 1.0, %v1162_v57 }
 0x5b1   :  { %v743_v60 = vmul.f32 %v741_v58, %v735_v59 }
 0x5b2   :  { %v1164_v0 = vpop.eup %1163 }
 0x5b3   :  { %v742_v63 = vadd.f32 1.0, %v1164_v0  ;;  %v745_v3 = vadd.f32 %v743_v60, %v1463_v61 }
 0x5b5   :  { %v744_v1 = vmul.f32 %v742_v63, %v736_v62 }
 0x5b7   :  { %v746_v4 = vadd.f32 %v744_v1, %v1467_v2 }
 0x5b9   :  { %v751_v5 = vpack.c.bf16 %v746_v4, %v745_v3 }
 0x5bb   :  { %1085 = vmatmul.mubr.bf16.vlgmr.msra.gmra.mxu0 %v751_v5 }
 0x67b   :  { %v857_v7 = vpop.f32.mrf.mxu0 }
 0x67c   :  { %v858_v8 = vadd.f32 %v934_v6, %v857_v7 }
 0x67d   :  { %v1086_v9 = vpop.f32.mrf.mxu0 }
 0x67e   :  { %864 = vst [vmem:[#allocation12] sm:$0xff] %v858_v8 }
 0x67f   :  { %v860_v10 = vpop.f32.mrf.mxu0 }
 0x680   :  { %v861_v11 = vadd.f32 %v934_v6, %v860_v10 }
 0x681   :  { %v1087_v12 = vpop.f32.mrf.mxu0 }
 0x682   :  { %865 = vst [vmem:[#allocation12 + $0x8] sm:$0xff] %v861_v11 }
 0x683   :  { %1276 = shalt.err (!%p1273_p1)
}
 0x684   :  { %s1303_s29 = smov 128   ;;  %s1304_s8 = smov 8  }
 0x685   :  { %877 = dma.vmem_to_hbm [thread:$0]  %s872_s27, 256, %s1516_s9, [#allocation5], %s1303_s29, %s1303_s29, %s1304_s8  }
 0x686   :  { %1291 = dma.done.wait [#allocation5], 256  }
 0x687   :  { %1292 = vsyncadd [#allocation5], 4294967040 }
 0x688   :  { %881 = vsyncpa [#allocation4], 1 }
 0x689   :  { %882 = vsyncpa [#allocation7], 1 }
 0x68a   :  { %883 = vsyncpa [#allocation10], 1 }
 0x68b   :  { %884 = vsyncpa [#allocation5], 1 }

</bundles_post_ra>
